<compile_context>
chip_gen: v7x
topology: tpu7x:2x2x1
jax: 0.10.0
libtpu: 0.0.40
codegen_flags: <defaults>
</compile_context>

<pallas_src>
import jax
import jax.numpy as jnp
from jax.experimental import pallas as pl
from jax.experimental.pallas import tpu as pltpu

EPS = 1e-5              # LayerNorm / InstanceNorm1d eps (PyTorch defaults)
GELU_APPROXIMATE = True  # tanh GELU on the EUP; set False for exact-erf parity


def _layernorm(x, gamma, beta):
    # x: (Bt, HW, C); normalize over channels (lane dim), affine gamma/beta (1, C).
    mu = jnp.mean(x, axis=-1, keepdims=True)
    var = jnp.mean((x - mu) ** 2, axis=-1, keepdims=True)
    return (x - mu) * jax.lax.rsqrt(var + EPS) * gamma + beta


def _instancenorm_hw(x):
    # x: (Bt, HW, C). InstanceNorm1d normalizes over the spatial (HW) dim per sample
    # and per channel (affine=False, biased variance).
    mu = jnp.mean(x, axis=1, keepdims=True)
    var = jnp.mean((x - mu) ** 2, axis=1, keepdims=True)
    return (x - mu) * jax.lax.rsqrt(var + EPS)


def tmem_kernel(x_ref, k_ref, v_ref, mask_ref, pvec_ref, wa_ref, w1_ref, out_ref):
    bt, hw, c = x_ref.shape

    x = x_ref[...]            # (Bt, HW, C)  f32
    k = k_ref[...]            # (Bt, C,  Nl) bf16 (pre-projected, pre-transposed)
    v = v_ref[...]            # (Bt, Nl, C)  bf16 (pre-projected)
    m = mask_ref[...]         # (Bt, 1,  Nl) f32

    # ---- packed parameters (static slices of the small slabs) ----
    pv = pvec_ref[...]        # (8, 2C) f32
    g1, be1 = pv[0:1, :c], pv[1:2, :c]
    bq, bw = pv[2:3, :c], pv[3:4, :c]
    g2, be2 = pv[4:5, :c], pv[5:6, :c]
    b2 = pv[6:7, :c]
    b1 = pv[7:8, :]           # (1, 2C)

    wa = wa_ref[...]          # (4C, C) bf16: [wq ; ww ; w2]
    wq, ww, w2 = wa[0:c, :], wa[c:2 * c, :], wa[2 * c:4 * c, :]
    w1 = w1_ref[...]          # (C, 2C) bf16

    # ---- norm1 (LayerNorm over channels) ----
    xn = _layernorm(x, g1, be1)

    # ---- SpatialImageLanguageAttention (num_heads = 1) ----
    # f_query: 1x1 conv (= matmul over channels) + InstanceNorm1d over HW.
    q = jnp.dot(xn.reshape(bt * hw, c).astype(jnp.bfloat16), wq,
                preferred_element_type=jnp.float32) + bq
    q = _instancenorm_hw(q.reshape(bt, hw, c))        # (Bt, HW, C)

    # scores: MXU-native contraction (k already (Bt, C, Nl)); additive mask alone
    # suffices (masked cols underflow to exactly 0 after exp, given >=1 valid token).
    sim = jnp.einsum("bqc,bck->bqk", q.astype(jnp.bfloat16), k,
                     preferred_element_type=jnp.float32) * (float(c) ** -0.5)
    sim = sim + (10000.0 * m - 10000.0)               # (Bt, HW, Nl)
    sim = sim - jnp.max(sim, axis=-1, keepdims=True)
    p = jnp.exp(sim)
    p = p * pl.reciprocal(jnp.sum(p, axis=-1, keepdims=True), approx=True)
    attn = jnp.einsum("bqk,bkc->bqc", p.astype(jnp.bfloat16), v,
                      preferred_element_type=jnp.float32)   # (Bt, HW, C)

    # output projection W: 1x1 conv + InstanceNorm1d over HW.
    o = jnp.dot(attn.reshape(bt * hw, c).astype(jnp.bfloat16), ww,
                preferred_element_type=jnp.float32) + bw
    o = _instancenorm_hw(o.reshape(bt, hw, c))

    r1 = x + o                                        # residual 1

    # ---- norm2 + FeedForward (Linear -> GELU -> Linear) ----
    n2 = _layernorm(r1, g2, be2)
    h = jnp.dot(n2.reshape(bt * hw, c).astype(jnp.bfloat16), w1,
                preferred_element_type=jnp.float32) + b1
    h = jax.nn.gelu(h, approximate=GELU_APPROXIMATE)
    ffo = jnp.dot(h.astype(jnp.bfloat16), w2,
                  preferred_element_type=jnp.float32) + b2

    out_ref[...] = r1 + ffo.reshape(bt, hw, c)


def _chip_kind():
    try:
        return jax.devices()[0].device_kind.lower()
    except Exception:
        return ""


def _tmem_forward(x, l, l_mask, params):
    """x: (B, C, H, W) f32; l: (B, 768, N_l) f32; l_mask: (B, N_l, 1) f32."""
    B, C, H, W = x.shape
    HW = H * W
    Nl = l.shape[2]

    (g1, be1, wq_t, bq, wk_t, bk, wv_t, bv, ww_t, bw,
     g2, be2, w1_t, b1, w2_t, b2) = params

    # ---- layout glue (fused into the single jit program) ----
    x_tok = jnp.transpose(x.reshape(B, C, HW), (0, 2, 1))       # (B, HW, C)
    mask = jnp.transpose(l_mask, (0, 2, 1))                     # (B, 1, Nl)

    # ---- hoisted f_key / f_value: ONE fused bf16 (B*Nl, 768) x (768, 2C) matmul ----
    lt = jnp.transpose(l, (0, 2, 1)).astype(jnp.bfloat16)       # (B, Nl, 768)
    wkv = jnp.concatenate([wk_t, wv_t], axis=1).astype(jnp.bfloat16)   # (768, 2C)
    bkv = jnp.concatenate([bk, bv], axis=1)                     # (1, 2C) f32
    kv = jnp.dot(lt.reshape(B * Nl, -1), wkv,
                 preferred_element_type=jnp.float32) + bkv
    kv = kv.reshape(B, Nl, 2 * C)
    k = jnp.transpose(kv[..., :C], (0, 2, 1)).astype(jnp.bfloat16)  # (B, C, Nl)
    v = kv[..., C:].astype(jnp.bfloat16)                            # (B, Nl, C)

    # ---- packed parameters: 3 arrays instead of 12 tiny ones ----
    def _padc(a):  # (1, C) -> (1, 2C)
        return jnp.pad(a, ((0, 0), (0, C)))
    pvec = jnp.concatenate([_padc(g1), _padc(be1), _padc(bq), _padc(bw),
                            _padc(g2), _padc(be2), _padc(b2), b1], axis=0)  # (8, 2C)
    wa = jnp.concatenate([wq_t, ww_t, w2_t], axis=0).astype(jnp.bfloat16)   # (4C, C)
    w1b = w1_t.astype(jnp.bfloat16)                                          # (C, 2C)

    # ---- chip-aware batch tiling ----
    kind = _chip_kind()
    is_v7 = "7" in kind  # v7x: 2 TensorCores, 64 MiB physical VMEM per TC
    per_b = HW * (12 * C + 2 * Nl) * 4 + 2 * Nl * C * 2   # rough live bytes / sample
    budget = (6 << 20) if is_v7 else (12 << 20)           # inputs double-buffered (x2)
    Bt = max(1, min(B, budget // max(per_b, 1)))
    if is_v7 and B >= 2:
        Bt = min(Bt, (B + 1) // 2)     # guarantee >= 2 grid steps -> both TCs busy
    Bp = ((B + Bt - 1) // Bt) * Bt     # pad batch instead of shrinking Bt for odd B
    if Bp != B:
        pad = Bp - B
        x_tok = jnp.pad(x_tok, ((0, pad), (0, 0), (0, 0)))
        k = jnp.pad(k, ((0, pad), (0, 0), (0, 0)))
        v = jnp.pad(v, ((0, pad), (0, 0), (0, 0)))
        mask = jnp.pad(mask, ((0, pad), (0, 0), (0, 0)))

    def batched(s1, s2):
        return pl.BlockSpec((Bt, s1, s2), lambda b: (b, 0, 0))

    def full2(shape):
        return pl.BlockSpec(shape, lambda b: (0, 0))

    in_specs = [
        batched(HW, C),          # x tokens
        batched(C, Nl),          # k (pre-projected, pre-transposed)
        batched(Nl, C),          # v (pre-projected)
        batched(1, Nl),          # language mask
        full2((8, 2 * C)),       # f32 vector slab
        full2((4 * C, C)),       # bf16 wq|ww|w2 slab
        full2((C, 2 * C)),       # bf16 w1
    ]

    flops = 2 * Bp * HW * (6 * C * C + 2 * C * Nl) + 40 * Bp * HW * C
    transcendentals = Bp * HW * (Nl + 2 * C + 8)
    bytes_accessed = (x_tok.size * 4 + k.size * 2 + v.size * 2 + mask.size * 4
                      + pvec.size * 4 + wa.size * 2 + w1b.size * 2
                      + Bp * HW * C * 4)
    cost = pl.CostEstimate(flops=int(flops), transcendentals=int(transcendentals),
                           bytes_accessed=int(bytes_accessed))

    compiler_params = pltpu.CompilerParams(
        # Batch-group axis is independent work -> shards across the 2 TCs on v7x.
        dimension_semantics=("parallel",),
        # v7x: 64 MiB physical VMEM -> stay <= 32 MiB; v5e/v6e: 128 MiB -> 64 MiB ok.
        vmem_limit_bytes=(32 << 20) if is_v7 else (64 << 20),
    )

    out = pl.pallas_call(
        tmem_kernel,
        out_shape=jax.ShapeDtypeStruct((Bp, HW, C), jnp.float32),
        grid=(Bp // Bt,),
        in_specs=in_specs,
        out_specs=pl.BlockSpec((Bt, HW, C), lambda b: (b, 0, 0)),
        compiler_params=compiler_params,
        cost_estimate=cost,
    )(x_tok, k, v, mask, pvec, wa, w1b)

    out = out[:B]
    # back to NCHW (fused in the same jit program)
    return jnp.transpose(out.reshape(B, H, W, C), (0, 3, 1, 2))


tmem_block = jax.jit(_tmem_forward)


def init_params(key, dim, l_dim=768):
    """Deterministic synthetic parameters matching TMEMBlock(dim, channels)."""
    ks = jax.random.split(key, 10)
    s = 0.02
    # LayerNorm 1 / 2
    g1 = jnp.ones((1, dim), jnp.float32)
    be1 = jnp.zeros((1, dim), jnp.float32)
    g2 = jnp.ones((1, dim), jnp.float32)
    be2 = jnp.zeros((1, dim), jnp.float32)
    # Attention convs (1x1 Conv1d) — stored pre-transposed as (in, out)
    wq_t = s * jax.random.normal(ks[0], (dim, dim), jnp.float32)
    bq = s * jax.random.normal(ks[1], (1, dim), jnp.float32)
    wk_t = s * jax.random.normal(ks[2], (l_dim, dim), jnp.float32)
    bk = s * jax.random.normal(ks[3], (1, dim), jnp.float32)
    wv_t = s * jax.random.normal(ks[4], (l_dim, dim), jnp.float32)
    bv = s * jax.random.normal(ks[5], (1, dim), jnp.float32)
    ww_t = s * jax.random.normal(ks[6], (dim, dim), jnp.float32)
    bw = s * jax.random.normal(ks[7], (1, dim), jnp.float32)
    # FeedForward: Linear(dim, 2*dim), Linear(2*dim, dim) — pre-transposed (in, out)
    w1_t = s * jax.random.normal(ks[8], (dim, 2 * dim), jnp.float32)
    b1 = jnp.zeros((1, 2 * dim), jnp.float32)
    w2_t = s * jax.random.normal(ks[9], (2 * dim, dim), jnp.float32)
    b2 = jnp.zeros((1, dim), jnp.float32)
    return (g1, be1, wq_t, bq, wk_t, bk, wv_t, bv, ww_t, bw,
            g2, be2, w1_t, b1, w2_t, b2)


if __name__ == "__main__":
    B, C, H, W = 2, 32, 8, 8      # dim = C = 32, HW = 64
    L_DIM, N_L = 768, 8

    key = jax.random.PRNGKey(0)
    kx, kl, kp = jax.random.split(key, 3)

    x = jax.random.normal(kx, (B, C, H, W), jnp.float32)
    l = jax.random.normal(kl, (B, L_DIM, N_L), jnp.float32)
    # binary language mask (last two tokens of sample 1 masked out, like padding)
    l_mask = jnp.ones((B, N_L, 1), jnp.float32)
    l_mask = l_mask.at[1, -2:, 0].set(0.0)

    params = init_params(kp, C, L_DIM)

    out = jax.block_until_ready(tmem_block(x, l, l_mask, params))

    assert out.shape == (B, C, H, W), out.shape
    assert bool(jnp.all(jnp.isfinite(out)))
    print("KERNEL_OK")
</pallas_src>

<mosaic_0001>
module attributes {stable_mosaic.version = 11 : i64} {
  func.func @tmem_kernel(%arg0: i32, %arg1: memref<2x64x32xf32, #tpu.memory_space<vmem>>, %arg2: memref<2x32x8xbf16, #tpu.memory_space<vmem>>, %arg3: memref<2x8x32xbf16, #tpu.memory_space<vmem>>, %arg4: memref<2x1x8xf32, #tpu.memory_space<vmem>>, %arg5: memref<8x64xf32, #tpu.memory_space<vmem>>, %arg6: memref<128x32xbf16, #tpu.memory_space<vmem>>, %arg7: memref<32x64xbf16, #tpu.memory_space<vmem>>, %arg8: memref<2x64x32xf32, #tpu.memory_space<vmem>>) attributes {dimension_semantics = [#tpu.dimension_semantics<parallel>], iteration_bounds = array<i64: 1>, scalar_prefetch = 0 : i64, scratch_operands = 0 : i64, tpu.core_type = #tpu.core_type<tc>, window_params = [{transform_indices = @transform_0, window_bounds = array<i64: 2, 64, 32>}, {transform_indices = @transform_1, window_bounds = array<i64: 2, 32, 8>}, {transform_indices = @transform_2, window_bounds = array<i64: 2, 8, 32>}, {transform_indices = @transform_3, window_bounds = array<i64: 2, 1, 8>}, {pipeline_mode = #tpu.pipeline_mode<synchronous>, transform_indices = @transform_4, window_bounds = array<i64: 8, 64>}, {pipeline_mode = #tpu.pipeline_mode<synchronous>, transform_indices = @transform_5, window_bounds = array<i64: 128, 32>}, {pipeline_mode = #tpu.pipeline_mode<synchronous>, transform_indices = @transform_6, window_bounds = array<i64: 32, 64>}, {transform_indices = @transform_7, window_bounds = array<i64: 2, 64, 32>}]} {
    %c0 = arith.constant 0 : index
    %c0_0 = arith.constant 0 : index
    %c0_1 = arith.constant 0 : index
    %0 = vector.load %arg1[%c0, %c0_0, %c0_1] : memref<2x64x32xf32, #tpu.memory_space<vmem>>, vector<2x64x32xf32>
    %c0_2 = arith.constant 0 : index
    %c0_3 = arith.constant 0 : index
    %c0_4 = arith.constant 0 : index
    %1 = vector.load %arg2[%c0_2, %c0_3, %c0_4] : memref<2x32x8xbf16, #tpu.memory_space<vmem>>, vector<2x32x8xbf16>
    %c0_5 = arith.constant 0 : index
    %c0_6 = arith.constant 0 : index
    %c0_7 = arith.constant 0 : index
    %2 = vector.load %arg3[%c0_5, %c0_6, %c0_7] : memref<2x8x32xbf16, #tpu.memory_space<vmem>>, vector<2x8x32xbf16>
    %c0_8 = arith.constant 0 : index
    %c0_9 = arith.constant 0 : index
    %c0_10 = arith.constant 0 : index
    %3 = vector.load %arg4[%c0_8, %c0_9, %c0_10] : memref<2x1x8xf32, #tpu.memory_space<vmem>>, vector<2x1x8xf32>
    %c0_11 = arith.constant 0 : index
    %c0_12 = arith.constant 0 : index
    %4 = vector.load %arg5[%c0_11, %c0_12] : memref<8x64xf32, #tpu.memory_space<vmem>>, vector<8x64xf32>
    %5 = vector.extract_strided_slice %4 {offsets = [0, 0], sizes = [1, 32], strides = [1, 1]} : vector<8x64xf32> to vector<1x32xf32>
    %6 = vector.extract_strided_slice %4 {offsets = [1, 0], sizes = [1, 32], strides = [1, 1]} : vector<8x64xf32> to vector<1x32xf32>
    %7 = vector.extract_strided_slice %4 {offsets = [2, 0], sizes = [1, 32], strides = [1, 1]} : vector<8x64xf32> to vector<1x32xf32>
    %8 = vector.extract_strided_slice %4 {offsets = [3, 0], sizes = [1, 32], strides = [1, 1]} : vector<8x64xf32> to vector<1x32xf32>
    %9 = vector.extract_strided_slice %4 {offsets = [4, 0], sizes = [1, 32], strides = [1, 1]} : vector<8x64xf32> to vector<1x32xf32>
    %10 = vector.extract_strided_slice %4 {offsets = [5, 0], sizes = [1, 32], strides = [1, 1]} : vector<8x64xf32> to vector<1x32xf32>
    %11 = vector.extract_strided_slice %4 {offsets = [6, 0], sizes = [1, 32], strides = [1, 1]} : vector<8x64xf32> to vector<1x32xf32>
    %12 = vector.extract_strided_slice %4 {offsets = [7, 0], sizes = [1, 64], strides = [1, 1]} : vector<8x64xf32> to vector<1x64xf32>
    %c0_13 = arith.constant 0 : index
    %c0_14 = arith.constant 0 : index
    %13 = vector.load %arg6[%c0_13, %c0_14] : memref<128x32xbf16, #tpu.memory_space<vmem>>, vector<128x32xbf16>
    %14 = vector.extract_strided_slice %13 {offsets = [0, 0], sizes = [32, 32], strides = [1, 1]} : vector<128x32xbf16> to vector<32x32xbf16>
    %15 = vector.extract_strided_slice %13 {offsets = [32, 0], sizes = [32, 32], strides = [1, 1]} : vector<128x32xbf16> to vector<32x32xbf16>
    %16 = vector.extract_strided_slice %13 {offsets = [64, 0], sizes = [64, 32], strides = [1, 1]} : vector<128x32xbf16> to vector<64x32xbf16>
    %c0_15 = arith.constant 0 : index
    %c0_16 = arith.constant 0 : index
    %17 = vector.load %arg7[%c0_15, %c0_16] : memref<32x64xbf16, #tpu.memory_space<vmem>>, vector<32x64xbf16>
    %cst = arith.constant dense<0.000000e+00> : vector<2x64xf32>
    %18 = vector.multi_reduction <add>, %0, %cst [2] : vector<2x64x32xf32> to vector<2x64xf32>
    %19 = vector.shape_cast %18 : vector<2x64xf32> to vector<2x64x1xf32>
    %cst_17 = arith.constant 3.200000e+01 : f32
    %20 = vector.broadcast %cst_17 : f32 to vector<2x64x1xf32>
    %21 = arith.divf %19, %20 : vector<2x64x1xf32>
    %22 = vector.broadcast %21 : vector<2x64x1xf32> to vector<2x64x32xf32>
    %23 = arith.subf %0, %22 : vector<2x64x32xf32>
    %24 = arith.mulf %23, %23 : vector<2x64x32xf32>
    %cst_18 = arith.constant dense<0.000000e+00> : vector<2x64xf32>
    %25 = vector.multi_reduction <add>, %24, %cst_18 [2] : vector<2x64x32xf32> to vector<2x64xf32>
    %26 = vector.shape_cast %25 : vector<2x64xf32> to vector<2x64x1xf32>
    %cst_19 = arith.constant 3.200000e+01 : f32
    %27 = vector.broadcast %cst_19 : f32 to vector<2x64x1xf32>
    %28 = arith.divf %26, %27 : vector<2x64x1xf32>
    %29 = vector.broadcast %21 : vector<2x64x1xf32> to vector<2x64x32xf32>
    %30 = arith.subf %0, %29 : vector<2x64x32xf32>
    %cst_20 = arith.constant 9.99999974E-6 : f32
    %31 = vector.broadcast %cst_20 : f32 to vector<2x64x1xf32>
    %32 = arith.addf %28, %31 : vector<2x64x1xf32>
    %33 = math.rsqrt %32 : vector<2x64x1xf32>
    %34 = vector.broadcast %33 : vector<2x64x1xf32> to vector<2x64x32xf32>
    %35 = arith.mulf %30, %34 : vector<2x64x32xf32>
    %36 = vector.shape_cast %5 : vector<1x32xf32> to vector<1x1x32xf32>
    %37 = vector.broadcast %36 : vector<1x1x32xf32> to vector<2x64x32xf32>
    %38 = arith.mulf %35, %37 : vector<2x64x32xf32>
    %39 = vector.shape_cast %6 : vector<1x32xf32> to vector<1x1x32xf32>
    %40 = vector.broadcast %39 : vector<1x1x32xf32> to vector<2x64x32xf32>
    %41 = arith.addf %38, %40 : vector<2x64x32xf32>
    %42 = vector.shape_cast %41 : vector<2x64x32xf32> to vector<128x32xf32>
    %43 = arith.truncf %42 : vector<128x32xf32> to vector<128x32xbf16>
    %cst_21 = arith.constant dense<0.000000e+00> : vector<128x32xf32>
    %44 = tpu.matmul %43, %14, %cst_21 {dimension_numbers = #tpu.dot_dimension_numbers<[1], [0], [0], [1], [0, 0, 1, 1], [], []>} : vector<128x32xbf16>, vector<32x32xbf16>, vector<128x32xf32> -> vector<128x32xf32>
    %45 = vector.broadcast %7 : vector<1x32xf32> to vector<128x32xf32>
    %46 = arith.addf %44, %45 : vector<128x32xf32>
    %47 = vector.shape_cast %46 : vector<128x32xf32> to vector<2x64x32xf32>
    %cst_22 = arith.constant dense<0.000000e+00> : vector<2x32xf32>
    %48 = vector.multi_reduction <add>, %47, %cst_22 [1] : vector<2x64x32xf32> to vector<2x32xf32>
    %49 = vector.shape_cast %48 : vector<2x32xf32> to vector<2x1x32xf32>
    %cst_23 = arith.constant 6.400000e+01 : f32
    %50 = vector.broadcast %cst_23 : f32 to vector<2x1x32xf32>
    %51 = arith.divf %49, %50 : vector<2x1x32xf32>
    %52 = vector.broadcast %51 : vector<2x1x32xf32> to vector<2x64x32xf32>
    %53 = arith.subf %47, %52 : vector<2x64x32xf32>
    %54 = arith.mulf %53, %53 : vector<2x64x32xf32>
    %cst_24 = arith.constant dense<0.000000e+00> : vector<2x32xf32>
    %55 = vector.multi_reduction <add>, %54, %cst_24 [1] : vector<2x64x32xf32> to vector<2x32xf32>
    %56 = vector.shape_cast %55 : vector<2x32xf32> to vector<2x1x32xf32>
    %cst_25 = arith.constant 6.400000e+01 : f32
    %57 = vector.broadcast %cst_25 : f32 to vector<2x1x32xf32>
    %58 = arith.divf %56, %57 : vector<2x1x32xf32>
    %59 = vector.broadcast %51 : vector<2x1x32xf32> to vector<2x64x32xf32>
    %60 = arith.subf %47, %59 : vector<2x64x32xf32>
    %cst_26 = arith.constant 9.99999974E-6 : f32
    %61 = vector.broadcast %cst_26 : f32 to vector<2x1x32xf32>
    %62 = arith.addf %58, %61 : vector<2x1x32xf32>
    %63 = math.rsqrt %62 : vector<2x1x32xf32>
    %64 = vector.broadcast %63 : vector<2x1x32xf32> to vector<2x64x32xf32>
    %65 = arith.mulf %60, %64 : vector<2x64x32xf32>
    %66 = arith.truncf %65 : vector<2x64x32xf32> to vector<2x64x32xbf16>
    "tpu.trace_start"() <{level = 10 : i32, message = "bqc,bck->bqk"}> : () -> ()
    %cst_27 = arith.constant dense<0.000000e+00> : vector<2x64x8xf32>
    %67 = tpu.matmul %66, %1, %cst_27 {dimension_numbers = #tpu.dot_dimension_numbers<[2], [1], [1], [2], [0, 0, 0, 1, 1, 2], [0], [0]>} : vector<2x64x32xbf16>, vector<2x32x8xbf16>, vector<2x64x8xf32> -> vector<2x64x8xf32>
    "tpu.trace_stop"() : () -> ()
    %cst_28 = arith.constant 0.176776692 : f32
    %68 = vector.broadcast %cst_28 : f32 to vector<2x64x8xf32>
    %69 = arith.mulf %67, %68 : vector<2x64x8xf32>
    %cst_29 = arith.constant 1.000000e+04 : f32
    %70 = vector.broadcast %cst_29 : f32 to vector<2x1x8xf32>
    %71 = arith.mulf %70, %3 : vector<2x1x8xf32>
    %cst_30 = arith.constant 1.000000e+04 : f32
    %72 = vector.broadcast %cst_30 : f32 to vector<2x1x8xf32>
    %73 = arith.subf %71, %72 : vector<2x1x8xf32>
    %74 = vector.broadcast %73 : vector<2x1x8xf32> to vector<2x64x8xf32>
    %75 = arith.addf %69, %74 : vector<2x64x8xf32>
    %cst_31 = arith.constant dense<0xFF800000> : vector<2x64xf32>
    %76 = vector.multi_reduction <maximumf>, %75, %cst_31 [2] : vector<2x64x8xf32> to vector<2x64xf32>
    %77 = vector.shape_cast %76 : vector<2x64xf32> to vector<2x64x1xf32>
    %78 = vector.broadcast %77 : vector<2x64x1xf32> to vector<2x64x8xf32>
    %79 = arith.subf %75, %78 : vector<2x64x8xf32>
    %80 = math.exp %79 : vector<2x64x8xf32>
    %cst_32 = arith.constant dense<0.000000e+00> : vector<2x64xf32>
    %81 = vector.multi_reduction <add>, %80, %cst_32 [2] : vector<2x64x8xf32> to vector<2x64xf32>
    %82 = vector.shape_cast %81 : vector<2x64xf32> to vector<2x64x1xf32>
    %83 = tpu.reciprocal %82 {approx = true} : vector<2x64x1xf32> -> vector<2x64x1xf32>
    %84 = vector.broadcast %83 : vector<2x64x1xf32> to vector<2x64x8xf32>
    %85 = arith.mulf %80, %84 : vector<2x64x8xf32>
    %86 = arith.truncf %85 : vector<2x64x8xf32> to vector<2x64x8xbf16>
    "tpu.trace_start"() <{level = 10 : i32, message = "bqk,bkc->bqc"}> : () -> ()
    %cst_33 = arith.constant dense<0.000000e+00> : vector<2x64x32xf32>
    %87 = tpu.matmul %86, %2, %cst_33 {dimension_numbers = #tpu.dot_dimension_numbers<[2], [1], [1], [2], [0, 0, 0, 1, 1, 2], [0], [0]>} : vector<2x64x8xbf16>, vector<2x8x32xbf16>, vector<2x64x32xf32> -> vector<2x64x32xf32>
    "tpu.trace_stop"() : () -> ()
    %88 = vector.shape_cast %87 : vector<2x64x32xf32> to vector<128x32xf32>
    %89 = arith.truncf %88 : vector<128x32xf32> to vector<128x32xbf16>
    %cst_34 = arith.constant dense<0.000000e+00> : vector<128x32xf32>
    %90 = tpu.matmul %89, %15, %cst_34 {dimension_numbers = #tpu.dot_dimension_numbers<[1], [0], [0], [1], [0, 0, 1, 1], [], []>} : vector<128x32xbf16>, vector<32x32xbf16>, vector<128x32xf32> -> vector<128x32xf32>
    %91 = vector.broadcast %8 : vector<1x32xf32> to vector<128x32xf32>
    %92 = arith.addf %90, %91 : vector<128x32xf32>
    %93 = vector.shape_cast %92 : vector<128x32xf32> to vector<2x64x32xf32>
    %cst_35 = arith.constant dense<0.000000e+00> : vector<2x32xf32>
    %94 = vector.multi_reduction <add>, %93, %cst_35 [1] : vector<2x64x32xf32> to vector<2x32xf32>
    %95 = vector.shape_cast %94 : vector<2x32xf32> to vector<2x1x32xf32>
    %cst_36 = arith.constant 6.400000e+01 : f32
    %96 = vector.broadcast %cst_36 : f32 to vector<2x1x32xf32>
    %97 = arith.divf %95, %96 : vector<2x1x32xf32>
    %98 = vector.broadcast %97 : vector<2x1x32xf32> to vector<2x64x32xf32>
    %99 = arith.subf %93, %98 : vector<2x64x32xf32>
    %100 = arith.mulf %99, %99 : vector<2x64x32xf32>
    %cst_37 = arith.constant dense<0.000000e+00> : vector<2x32xf32>
    %101 = vector.multi_reduction <add>, %100, %cst_37 [1] : vector<2x64x32xf32> to vector<2x32xf32>
    %102 = vector.shape_cast %101 : vector<2x32xf32> to vector<2x1x32xf32>
    %cst_38 = arith.constant 6.400000e+01 : f32
    %103 = vector.broadcast %cst_38 : f32 to vector<2x1x32xf32>
    %104 = arith.divf %102, %103 : vector<2x1x32xf32>
    %105 = vector.broadcast %97 : vector<2x1x32xf32> to vector<2x64x32xf32>
    %106 = arith.subf %93, %105 : vector<2x64x32xf32>
    %cst_39 = arith.constant 9.99999974E-6 : f32
    %107 = vector.broadcast %cst_39 : f32 to vector<2x1x32xf32>
    %108 = arith.addf %104, %107 : vector<2x1x32xf32>
    %109 = math.rsqrt %108 : vector<2x1x32xf32>
    %110 = vector.broadcast %109 : vector<2x1x32xf32> to vector<2x64x32xf32>
    %111 = arith.mulf %106, %110 : vector<2x64x32xf32>
    %112 = arith.addf %0, %111 : vector<2x64x32xf32>
    %cst_40 = arith.constant dense<0.000000e+00> : vector<2x64xf32>
    %113 = vector.multi_reduction <add>, %112, %cst_40 [2] : vector<2x64x32xf32> to vector<2x64xf32>
    %114 = vector.shape_cast %113 : vector<2x64xf32> to vector<2x64x1xf32>
    %cst_41 = arith.constant 3.200000e+01 : f32
    %115 = vector.broadcast %cst_41 : f32 to vector<2x64x1xf32>
    %116 = arith.divf %114, %115 : vector<2x64x1xf32>
    %117 = vector.broadcast %116 : vector<2x64x1xf32> to vector<2x64x32xf32>
    %118 = arith.subf %112, %117 : vector<2x64x32xf32>
    %119 = arith.mulf %118, %118 : vector<2x64x32xf32>
    %cst_42 = arith.constant dense<0.000000e+00> : vector<2x64xf32>
    %120 = vector.multi_reduction <add>, %119, %cst_42 [2] : vector<2x64x32xf32> to vector<2x64xf32>
    %121 = vector.shape_cast %120 : vector<2x64xf32> to vector<2x64x1xf32>
    %cst_43 = arith.constant 3.200000e+01 : f32
    %122 = vector.broadcast %cst_43 : f32 to vector<2x64x1xf32>
    %123 = arith.divf %121, %122 : vector<2x64x1xf32>
    %124 = vector.broadcast %116 : vector<2x64x1xf32> to vector<2x64x32xf32>
    %125 = arith.subf %112, %124 : vector<2x64x32xf32>
    %cst_44 = arith.constant 9.99999974E-6 : f32
    %126 = vector.broadcast %cst_44 : f32 to vector<2x64x1xf32>
    %127 = arith.addf %123, %126 : vector<2x64x1xf32>
    %128 = math.rsqrt %127 : vector<2x64x1xf32>
    %129 = vector.broadcast %128 : vector<2x64x1xf32> to vector<2x64x32xf32>
    %130 = arith.mulf %125, %129 : vector<2x64x32xf32>
    %131 = vector.shape_cast %9 : vector<1x32xf32> to vector<1x1x32xf32>
    %132 = vector.broadcast %131 : vector<1x1x32xf32> to vector<2x64x32xf32>
    %133 = arith.mulf %130, %132 : vector<2x64x32xf32>
    %134 = vector.shape_cast %10 : vector<1x32xf32> to vector<1x1x32xf32>
    %135 = vector.broadcast %134 : vector<1x1x32xf32> to vector<2x64x32xf32>
    %136 = arith.addf %133, %135 : vector<2x64x32xf32>
    %137 = vector.shape_cast %136 : vector<2x64x32xf32> to vector<128x32xf32>
    %138 = arith.truncf %137 : vector<128x32xf32> to vector<128x32xbf16>
    %cst_45 = arith.constant dense<0.000000e+00> : vector<128x64xf32>
    %139 = tpu.matmul %138, %17, %cst_45 {dimension_numbers = #tpu.dot_dimension_numbers<[1], [0], [0], [1], [0, 0, 1, 1], [], []>} : vector<128x32xbf16>, vector<32x64xbf16>, vector<128x64xf32> -> vector<128x64xf32>
    %140 = vector.broadcast %12 : vector<1x64xf32> to vector<128x64xf32>
    %141 = arith.addf %139, %140 : vector<128x64xf32>
    %142 = arith.mulf %141, %141 : vector<128x64xf32>
    %143 = arith.mulf %141, %142 : vector<128x64xf32>
    %cst_46 = arith.constant 4.471500e-02 : f32
    %144 = vector.broadcast %cst_46 : f32 to vector<128x64xf32>
    %145 = arith.mulf %144, %143 : vector<128x64xf32>
    %146 = arith.addf %141, %145 : vector<128x64xf32>
    %cst_47 = arith.constant 0.797884583 : f32
    %147 = vector.broadcast %cst_47 : f32 to vector<128x64xf32>
    %148 = arith.mulf %147, %146 : vector<128x64xf32>
    %149 = math.tanh %148 : vector<128x64xf32>
    %cst_48 = arith.constant 1.000000e+00 : f32
    %150 = vector.broadcast %cst_48 : f32 to vector<128x64xf32>
    %151 = arith.addf %150, %149 : vector<128x64xf32>
    %cst_49 = arith.constant 5.000000e-01 : f32
    %152 = vector.broadcast %cst_49 : f32 to vector<128x64xf32>
    %153 = arith.mulf %152, %151 : vector<128x64xf32>
    %154 = arith.mulf %141, %153 : vector<128x64xf32>
    %155 = arith.truncf %154 : vector<128x64xf32> to vector<128x64xbf16>
    %cst_50 = arith.constant dense<0.000000e+00> : vector<128x32xf32>
    %156 = tpu.matmul %155, %16, %cst_50 {dimension_numbers = #tpu.dot_dimension_numbers<[1], [0], [0], [1], [0, 0, 1, 1], [], []>} : vector<128x64xbf16>, vector<64x32xbf16>, vector<128x32xf32> -> vector<128x32xf32>
    %157 = vector.broadcast %11 : vector<1x32xf32> to vector<128x32xf32>
    %158 = arith.addf %156, %157 : vector<128x32xf32>
    %159 = vector.shape_cast %158 : vector<128x32xf32> to vector<2x64x32xf32>
    %160 = arith.addf %112, %159 : vector<2x64x32xf32>
    %c0_51 = arith.constant 0 : index
    %c0_52 = arith.constant 0 : index
    %c0_53 = arith.constant 0 : index
    %161 = vector.load %arg8[%c0_51, %c0_52, %c0_53] : memref<2x64x32xf32, #tpu.memory_space<vmem>>, vector<2x64x32xf32>
    tpu.vector_store %arg8[%c0_51, %c0_52, %c0_53], %160 {strides = array<i32>} : memref<2x64x32xf32, #tpu.memory_space<vmem>>, vector<2x64x32xf32>,
    return
  }
  func.func @transform_0(%arg0: i32) -> (i32, i32, i32) {
    %c0_i32 = arith.constant 0 : i32
    %c0_i32_0 = arith.constant 0 : i32
    %c0_i32_1 = arith.constant 0 : i32
    return %arg0, %c0_i32, %c0_i32_0 : i32, i32, i32
  }
  func.func @transform_1(%arg0: i32) -> (i32, i32, i32) {
    %c0_i32 = arith.constant 0 : i32
    %c0_i32_0 = arith.constant 0 : i32
    %c0_i32_1 = arith.constant 0 : i32
    return %arg0, %c0_i32, %c0_i32_0 : i32, i32, i32
  }
  func.func @transform_2(%arg0: i32) -> (i32, i32, i32) {
    %c0_i32 = arith.constant 0 : i32
    %c0_i32_0 = arith.constant 0 : i32
    %c0_i32_1 = arith.constant 0 : i32
    return %arg0, %c0_i32, %c0_i32_0 : i32, i32, i32
  }
  func.func @transform_3(%arg0: i32) -> (i32, i32, i32) {
    %c0_i32 = arith.constant 0 : i32
    %c0_i32_0 = arith.constant 0 : i32
    %c0_i32_1 = arith.constant 0 : i32
    return %arg0, %c0_i32, %c0_i32_0 : i32, i32, i32
  }
  func.func @transform_4(%arg0: i32) -> (i32, i32) {
    %c0_i32 = arith.constant 0 : i32
    %c0_i32_0 = arith.constant 0 : i32
    %c0_i32_1 = arith.constant 0 : i32
    return %c0_i32, %c0_i32_0 : i32, i32
  }
  func.func @transform_5(%arg0: i32) -> (i32, i32) {
    %c0_i32 = arith.constant 0 : i32
    %c0_i32_0 = arith.constant 0 : i32
    %c0_i32_1 = arith.constant 0 : i32
    return %c0_i32, %c0_i32_0 : i32, i32
  }
  func.func @transform_6(%arg0: i32) -> (i32, i32) {
    %c0_i32 = arith.constant 0 : i32
    %c0_i32_0 = arith.constant 0 : i32
    %c0_i32_1 = arith.constant 0 : i32
    return %c0_i32, %c0_i32_0 : i32, i32
  }
  func.func @transform_7(%arg0: i32) -> (i32, i32, i32) {
    %c0_i32 = arith.constant 0 : i32
    %c0_i32_0 = arith.constant 0 : i32
    %c0_i32_1 = arith.constant 0 : i32
    return %arg0, %c0_i32, %c0_i32_0 : i32, i32, i32
  }
}

</mosaic_0001>

<bundles_post_ra>
// kernel: _tmem_forward.1
= control target key start
LH: loop header
LB: loop body
LE: loop exit
PB: predicated region body
PF: predicated region fallthrough
CT: control target
= control target key end

     0   :  { %12 = vsyncpa [#allocation3], 0  ;;  %s4287_s0 = inlined_call_operand.hbm [shape: f32[2,64,32], index: 0, kind: input, shape index: {}]   ;;  %s4288_s1 = inlined_call_operand.hbm [shape: bf16[2,32,8], index: 1, kind: input, shape index: {}]   ;;  %s4289_s2 = inlined_call_operand.hbm [shape: bf16[2,8,32], index: 2, kind: input, shape index: {}]   ;;  %s4290_s3 = inlined_call_operand.hbm [shape: f32[2,1,8], index: 3, kind: input, shape index: {}]   ;;  %s4291_s4 = inlined_call_operand.hbm [shape: f32[8,64], index: 4, kind: input, shape index: {}]   ;;  %s4292_s5 = inlined_call_operand.hbm [shape: bf16[128,32], index: 5, kind: input, shape index: {}]   ;;  %s4293_s6 = inlined_call_operand.hbm [shape: bf16[32,64], index: 6, kind: input, shape index: {}]   ;;  %s4294_s7 = inlined_call_operand.hbm [shape: f32[2,64,32], index: 7, kind: output, shape index: {}]  }
   0x1   :  { %13 = vsyncpa [#allocation6], 0 }
   0x2   :  { %14 = vsyncpa [#allocation9], 0 }
   0x3   :  { %15 = vsyncpa [#allocation12], 0 }
   0x4   :  { %16 = vsyncpa [#allocation4], 0  ;;  %s2996_s24 = smov [#allocation5]   ;;  %s2810_s28 = scalar_lea.hbm %s4288_s1, 512 }
   0x5   :  { %s34_s25 = sshll.u32 %s2996_s24, 4  ;;  %p2811_p0 = scmp.ne.s32.totalorder %s4288_s1, %s2810_s28  ;;  %s35_s25 = int_to_ptr.vmem [resolvable:$true] %s34_s25 }
   0x6   :  { %p2814_p1 = scmp.lt.u32.totalorder %s2810_s28, %s4288_s1 }
   0x8   :  { %p2816_p2 = pnand %p2814_p1, %p2811_p0 }
   0xa   :  { %2819 = shalt.err (!%p2816_p2)
}
   0xb   :  { %s2820_s10 = scalar_lea.vmem %s35_s25, 512  ;;  %p2825_p4 = scmp.lt.s32.totalorder %s35_s25, %s35_s25 }
   0xc   :  { %p2821_p3 = scmp.ne.s32.totalorder %s35_s25, %s2820_s10  ;;  %p2826_p5 = scmp.lt.s32.totalorder %s2820_s10, %s2820_s10 }
   0xe   :  { %p2827_p6 = por %p2826_p5, %p2825_p4 }
  0x10   :  { %p2828_p7 = pnand %p2827_p6, %p2821_p3 }
  0x12   :  { %2831 = shalt.err (!%p2828_p7)
}
  0x13   :  { %s2997_s11 = smov 64   ;;  %s2998_s12 = smov 4  }
  0x14   :  { %40 = dma.hbm_to_vmem [thread:$0]  %s4288_s1, 512, %s35_s25, [#allocation6], %s2997_s11, %s2997_s11, %s2998_s12  }
  0x15   :  { %s2999_s15 = smov [#allocation8]   ;;  %s2832_s19 = scalar_lea.hbm %s4290_s3, 32 }
  0x16   :  { %s58_s16 = sshll.u32 %s2999_s15, 4  ;;  %p2833_p8 = scmp.ne.s32.totalorder %s4290_s3, %s2832_s19  ;;  %s59_s16 = int_to_ptr.vmem [resolvable:$true] %s58_s16 }
  0x17   :  { %p2836_p9 = scmp.lt.u32.totalorder %s2832_s19, %s4290_s3 }
  0x19   :  { %p2838_p10 = pnand %p2836_p9, %p2833_p8 }
  0x1b   :  { %2841 = shalt.err (!%p2838_p10)
}
  0x1c   :  { %s2842_s24 = scalar_lea.vmem %s59_s16, 32  ;;  %p2847_p12 = scmp.lt.s32.totalorder %s59_s16, %s59_s16 }
  0x1d   :  { %p2843_p11 = scmp.ne.s32.totalorder %s59_s16, %s2842_s24  ;;  %p2848_p13 = scmp.lt.s32.totalorder %s2842_s24, %s2842_s24 }
  0x1f   :  { %p2849_p0 = por %p2848_p13, %p2847_p12 }
  0x21   :  { %p2850_p1 = pnand %p2849_p0, %p2843_p11 }
  0x23   :  { %2853 = shalt.err (!%p2850_p1)
}
  0x24   :  { %s3000_s1 = smov 16   ;;  %s3001_s25 = smov 1  }
  0x25   :  { %64 = dma.hbm_to_vmem [thread:$0]  %s4290_s3, 32, %s59_s16, [#allocation9], %s3000_s1, %s3000_s1, %s3001_s25  }
  0x26   :  { %s3002_s28 = smov [#allocation11]   ;;  %s3003_s30 = smov [#allocation2]  }
  0x27   :  { %s80_s29 = sshll.u32 %s3002_s28, 4  ;;  %s22_s8 = sshll.u32 %s3003_s30, 4  ;;  %s81_s29 = int_to_ptr.vmem [resolvable:$true] %s80_s29  ;;  %s3077_s8 = int_to_ptr.vmem [resolvable:$true] %s22_s8 }
  0x28   :  { %s2854_s13 = scalar_lea.hbm %s4292_s5, 1024 }
  0x29   :  { %p2855_p2 = scmp.ne.s32.totalorder %s4292_s5, %s2854_s13  ;;  %p2858_p3 = scmp.lt.u32.totalorder %s2854_s13, %s4292_s5 }
  0x2b   :  { %p2860_p4 = pnand %p2858_p3, %p2855_p2 }
  0x2d   :  { %2863 = shalt.err (!%p2860_p4)
}
  0x2e   :  { %s2864_s3 = scalar_lea.vmem %s81_s29, 1024  ;;  %p2869_p6 = scmp.lt.s32.totalorder %s81_s29, %s81_s29 }
  0x2f   :  { %p2865_p5 = scmp.ne.s32.totalorder %s81_s29, %s2864_s3  ;;  %p2870_p7 = scmp.lt.s32.totalorder %s2864_s3, %s2864_s3 }
  0x31   :  { %p2871_p8 = por %p2870_p7, %p2869_p6 }
  0x33   :  { %p2872_p9 = pnand %p2871_p8, %p2865_p5 }
  0x35   :  { %2875 = shalt.err (!%p2872_p9)
}
  0x36   :  { %86 = dma.hbm_to_vmem [thread:$0]  %s4292_s5, 1024, %s81_s29, [#allocation12], %s2997_s11, %s2997_s11, %s2998_s12  }
  0x37   :  { %s2876_s22 = scalar_lea.hbm %s4287_s0, 2048 }
  0x38   :  { %p2877_p10 = scmp.ne.s32.totalorder %s4287_s0, %s2876_s22  ;;  %p2880_p11 = scmp.lt.u32.totalorder %s2876_s22, %s4287_s0 }
  0x3a   :  { %p2882_p12 = pnand %p2880_p11, %p2877_p10 }
  0x3c   :  { %2885 = shalt.err (!%p2882_p12)
}
  0x3d   :  { %s2886_s26 = scalar_lea.vmem %s3077_s8, 2048  ;;  %p2891_p0 = scmp.lt.s32.totalorder %s3077_s8, %s3077_s8 }
  0x3e   :  { %p2887_p13 = scmp.ne.s32.totalorder %s3077_s8, %s2886_s26  ;;  %p2892_p1 = scmp.lt.s32.totalorder %s2886_s26, %s2886_s26 }
  0x40   :  { %p2893_p2 = por %p2892_p1, %p2891_p0 }
  0x42   :  { %p2894_p3 = pnand %p2893_p2, %p2887_p13 }
  0x44   :  { %2897 = shalt.err (!%p2894_p3)
}
  0x45   :  { %s3004_s5 = smov 128   ;;  %s3005_s27 = smov 8  }
  0x46   :  { %28 = dma.hbm_to_vmem [thread:$0]  %s4287_s0, 2048, %s3077_s8, [#allocation3], %s3004_s5, %s3004_s5, %s3005_s27  }
  0x47   :  { %s3006_s30 = smov [#allocation7]   ;;  %s3007_s10 = smov [#allocation10]  }
  0x48   :  { %s46_s9 = sshll.u32 %s3006_s30, 4  ;;  %s71_s13 = sshll.u32 %s3007_s10, 4  ;;  %s47_s9 = int_to_ptr.vmem [resolvable:$true] %s46_s9  ;;  %s72_s13 = int_to_ptr.vmem [resolvable:$true] %s71_s13 }
  0x49   :  { %s2898_s17 = scalar_lea.hbm %s4289_s2, 128 }
  0x4a   :  { %p2899_p4 = scmp.ne.s32.totalorder %s4289_s2, %s2898_s17  ;;  %p2902_p5 = scmp.lt.u32.totalorder %s2898_s17, %s4289_s2 }
  0x4c   :  { %p2904_p6 = pnand %p2902_p5, %p2899_p4 }
  0x4e   :  { %2907 = shalt.err (!%p2904_p6)
}
  0x4f   :  { %s2908_s0 = scalar_lea.vmem %s47_s9, 128  ;;  %p2913_p8 = scmp.lt.s32.totalorder %s47_s9, %s47_s9 }
  0x50   :  { %p2909_p7 = scmp.ne.s32.totalorder %s47_s9, %s2908_s0  ;;  %p2914_p9 = scmp.lt.s32.totalorder %s2908_s0, %s2908_s0 }
  0x52   :  { %p2915_p10 = por %p2914_p9, %p2913_p8 }
  0x54   :  { %p2916_p11 = pnand %p2915_p10, %p2909_p7 }
  0x56   :  { %2919 = shalt.err (!%p2916_p11)
}
  0x57   :  { %52 = dma.hbm_to_vmem [thread:$0]  %s4289_s2, 128, %s47_s9, [#allocation6], %s2997_s11, %s2997_s11, %s2998_s12  }
  0x58   :  { %s2920_s23 = scalar_lea.hbm %s4291_s4, 128 }
  0x59   :  { %p2921_p12 = scmp.ne.s32.totalorder %s4291_s4, %s2920_s23  ;;  %p2924_p13 = scmp.lt.u32.totalorder %s2920_s23, %s4291_s4 }
  0x5b   :  { %p2926_p0 = pnand %p2924_p13, %p2921_p12 }
  0x5d   :  { %2929 = shalt.err (!%p2926_p0)
}
  0x5e   :  { %s2930_s28 = scalar_lea.vmem %s72_s13, 128  ;;  %p2935_p2 = scmp.lt.s32.totalorder %s72_s13, %s72_s13 }
  0x5f   :  { %p2931_p1 = scmp.ne.s32.totalorder %s72_s13, %s2930_s28  ;;  %p2936_p3 = scmp.lt.s32.totalorder %s2930_s28, %s2930_s28 }
  0x61   :  { %p2937_p4 = por %p2936_p3, %p2935_p2 }
  0x63   :  { %p2938_p5 = pnand %p2937_p4, %p2931_p1 }
  0x65   :  { %2941 = shalt.err (!%p2938_p5)
}
  0x66   :  { %74 = dma.hbm_to_vmem [thread:$0]  %s4291_s4, 128, %s72_s13, [#allocation9]  }
  0x67   :  { %s3008_s30 = smov [#allocation13]   ;;  %s2942_s15 = scalar_lea.hbm %s4293_s6, 256 }
  0x68   :  { %s92_s9 = sshll.u32 %s3008_s30, 4  ;;  %p2943_p6 = scmp.ne.s32.totalorder %s4293_s6, %s2942_s15  ;;  %s93_s9 = int_to_ptr.vmem [resolvable:$true] %s92_s9 }
  0x69   :  { %p2946_p7 = scmp.lt.u32.totalorder %s2942_s15, %s4293_s6 }
  0x6b   :  { %p2948_p8 = pnand %p2946_p7, %p2943_p6 }
  0x6d   :  { %2951 = shalt.err (!%p2948_p8)
}
  0x6e   :  { %s2952_s19 = scalar_lea.vmem %s93_s9, 256  ;;  %p2957_p10 = scmp.lt.s32.totalorder %s93_s9, %s93_s9 }
  0x6f   :  { %p2953_p9 = scmp.ne.s32.totalorder %s93_s9, %s2952_s19  ;;  %p2958_p11 = scmp.lt.s32.totalorder %s2952_s19, %s2952_s19 }
  0x71   :  { %p2959_p12 = por %p2958_p11, %p2957_p10 }
  0x73   :  { %p2960_p13 = pnand %p2959_p12, %p2953_p9 }
  0x75   :  { %2963 = shalt.err (!%p2960_p13)
}
  0x76   :  { %98 = dma.hbm_to_vmem [thread:$0]  %s4293_s6, 256, %s93_s9, [#allocation12], %s2997_s11, %s2997_s11, %s2998_s12  }
  0x77   :  { %2986 = dma.done.wait [#allocation3], 2048  }
  0x78   :  { %2987 = vsyncadd [#allocation3], 4294965248 }
  0x79   :  { %2988 = dma.done.wait [#allocation6], 640  }
  0x7a   :  { %2989 = vsyncadd [#allocation6], 4294966656 }
  0x7b   :  { %2990 = dma.done.wait [#allocation9], 160  }
  0x7c   :  { %2991 = vsyncadd [#allocation9], 4294967136 }
  0x7d   :  { %2992 = dma.done.wait [#allocation12], 1280  }
  0x7e   :  { %2993 = vsyncadd [#allocation12], 4294966016  ;;  %vm170_vm0 = vcmask 261120   ;;  %v121_v0 = vld [vmem:[#allocation2] sm:$0xff]  ;;  %v123_v1 = vld [vmem:[#allocation2 + $0x10] sm:$0xff]  ;;  %vm940_vm1 = vcmask 64512  }
  0x7f   :  { %v122_v2 = vld [vmem:[#allocation2 + $0x8] sm:$0xff]  ;;  %v171_v3 = vsel %vm170_vm0, %v121_v0, 0.0  ;;  %v177_v4 = vsel %vm170_vm0, %v123_v1, 0.0  ;;  %v124_v5 = vld [vmem:[#allocation2 + $0x18] sm:$0xff]  ;;  %v3158_v6 = vld [vmem:[#allocation2 + $0x20] sm:$0xff]  ;;  %vm1137_vm2 = vcmask 1043456  }
  0x80   :  { %172 = vadd.xlane.f32.xlu0 %v171_v3  ;;  %178 = vadd.xlane.f32.xlu1 %v177_v4  ;;  %v3160_v7 = vld [vmem:[#allocation2 + $0x28] sm:$0xff]  ;;  %v174_v8 = vsel %vm170_vm0, %v122_v2, 0.0  ;;  %v180_v9 = vsel %vm170_vm0, %v124_v5, 0.0  ;;  %v3164_v10 = vld [vmem:[#allocation2 + $0x30] sm:$0xff]  ;;  %v3166_v11 = vld [vmem:[#allocation2 + $0x38] sm:$0xff]  ;;  %v183_v12 = vsel %vm170_vm0, %v3158_v6, 0.0 }
  0x81   :  { %v186_v13 = vsel %vm170_vm0, %v3160_v7, 0.0  ;;  %v189_v14 = vsel %vm170_vm0, %v3164_v10, 0.0  ;;  %v192_v15 = vsel %vm170_vm0, %v3166_v11, 0.0  ;;  %v3176_v16 = vld [vmem:[#allocation2 + $0x40] sm:$0xff]  ;;  %v3178_v17 = vld [vmem:[#allocation2 + $0x48] sm:$0xff]  ;;  %v3184_v20 = vld [vmem:[#allocation2 + $0x50] sm:$0xff] }
  0x82   :  { %v195_v18 = vsel %vm170_vm0, %v3176_v16, 0.0  ;;  %v198_v19 = vsel %vm170_vm0, %v3178_v17, 0.0  ;;  %v3186_v21 = vld [vmem:[#allocation2 + $0x58] sm:$0xff]  ;;  %v201_v22 = vsel %vm170_vm0, %v3184_v20, 0.0  ;;  %v3192_v24 = vld [vmem:[#allocation2 + $0x60] sm:$0xff]  ;;  %v3194_v25 = vld [vmem:[#allocation2 + $0x68] sm:$0xff] }
  0x83   :  { %v204_v23 = vsel %vm170_vm0, %v3186_v21, 0.0  ;;  %v207_v26 = vsel %vm170_vm0, %v3192_v24, 0.0  ;;  %v210_v27 = vsel %vm170_vm0, %v3194_v25, 0.0  ;;  %v3200_v28 = vld [vmem:[#allocation2 + $0x70] sm:$0xff]  ;;  %v3202_v29 = vld [vmem:[#allocation2 + $0x78] sm:$0xff]  ;;  %vm2160_vm3 = vcmask 523264  }
  0x84   :  { %175 = vadd.xlane.f32.xlu0 %v174_v8  ;;  %181 = vadd.xlane.f32.xlu1 %v180_v9  ;;  %v213_v30 = vsel %vm170_vm0, %v3200_v28, 0.0  ;;  %v216_v31 = vsel %vm170_vm0, %v3202_v29, 0.0  ;;  %s3009_s6 = smov [#allocation14]  }
  0x85   :  { %s2319_s11 = sshll.u32 %s3009_s6, 4  ;;  %s2320_s11 = int_to_ptr.vmem [resolvable:$true] %s2319_s11 }
  0x86   :  { %s2964_s12 = scalar_lea.vmem %s2320_s11, 2048  ;;  %p2969_p1 = scmp.lt.s32.totalorder %s2320_s11, %s2320_s11 }
  0x87   :  { %p2965_p0 = scmp.ne.s32.totalorder %s2320_s11, %s2964_s12  ;;  %p2970_p2 = scmp.lt.s32.totalorder %s2964_s12, %s2964_s12 }
  0x88   :  { %184 = vadd.xlane.f32.xlu0 %v183_v12  ;;  %187 = vadd.xlane.f32.xlu1 %v186_v13 }
  0x89   :  { %p2971_p3 = por %p2970_p2, %p2969_p1 }
  0x8b   :  { %p2972_p4 = pnand %p2971_p3, %p2965_p0 }
  0x8c   :  { %190 = vadd.xlane.f32.xlu0 %v189_v14  ;;  %193 = vadd.xlane.f32.xlu1 %v192_v15 }
  0x90   :  { %196 = vadd.xlane.f32.xlu0 %v195_v18  ;;  %199 = vadd.xlane.f32.xlu1 %v198_v19 }
  0x94   :  { %202 = vadd.xlane.f32.xlu0 %v201_v22  ;;  %205 = vadd.xlane.f32.xlu1 %v204_v23 }
  0x98   :  { %208 = vadd.xlane.f32.xlu0 %v207_v26  ;;  %211 = vadd.xlane.f32.xlu1 %v210_v27 }
  0x9c   :  { %214 = vadd.xlane.f32.xlu0 %v213_v30  ;;  %217 = vadd.xlane.f32.xlu1 %v216_v31 }
 0x10d   :  { %v173_v32 = vpop.xlane.xlu0 %172  ;;  %v179_v33 = vpop.xlane.xlu1 %178 }
 0x10e   :  { %v220_v34 = vmul.f32 0.03125, %v173_v32  ;;  %v222_v35 = vmul.f32 0.03125, %v179_v33 }
 0x110   :  { %v3208_v36 = vsub.f32 %v121_v0, %v220_v34  ;;  %v3210_v37 = vsub.f32 %v123_v1, %v222_v35 }
 0x111   :  { %v176_v38 = vpop.xlane.xlu0 %175  ;;  %v182_v39 = vpop.xlane.xlu1 %181 }
 0x112   :  { %v221_v40 = vmul.f32 0.03125, %v176_v38  ;;  %v223_v41 = vmul.f32 0.03125, %v182_v39  ;;  %v252_v42 = vmul.f32 %v3208_v36, %v3208_v36  ;;  %v254_v43 = vmul.f32 %v3210_v37, %v3210_v37 }
 0x114   :  { %v3216_v44 = vsub.f32 %v122_v2, %v221_v40  ;;  %v3218_v45 = vsub.f32 %v124_v5, %v223_v41  ;;  %v268_v46 = vsel %vm170_vm0, %v252_v42, 0.0  ;;  %v274_v49 = vsel %vm170_vm0, %v254_v43, 0.0 }
 0x115   :  { %269 = vadd.xlane.f32.xlu0 %v268_v46  ;;  %v185_v47 = vpop.xlane.xlu0 %184  ;;  %v188_v48 = vpop.xlane.xlu1 %187 }
 0x116   :  { %v224_v50 = vmul.f32 0.03125, %v185_v47  ;;  %v225_v51 = vmul.f32 0.03125, %v188_v48  ;;  %v253_v52 = vmul.f32 %v3216_v44, %v3216_v44  ;;  %v255_v53 = vmul.f32 %v3218_v45, %v3218_v45 }
 0x118   :  { %v3227_v54 = vsub.f32 %v3158_v6, %v224_v50  ;;  %v3230_v55 = vsub.f32 %v3160_v7, %v225_v51  ;;  %v271_v56 = vsel %vm170_vm0, %v253_v52, 0.0  ;;  %v277_v59 = vsel %vm170_vm0, %v255_v53, 0.0  ;;  %v2611_v53 = vld [vmem:[#allocation11 + $0x8] sm:$0xff]  }
 0x119   :  { %275 = vadd.xlane.f32.xlu0 %v274_v49  ;;  %272 = vadd.xlane.f32.xlu1 %v271_v56  ;;  %v191_v57 = vpop.xlane.xlu0 %190  ;;  %v194_v58 = vpop.xlane.xlu1 %193 }
 0x11a   :  { %v226_v60 = vmul.f32 0.03125, %v191_v57  ;;  %v227_v61 = vmul.f32 0.03125, %v194_v58  ;;  %v256_v62 = vmul.f32 %v3227_v54, %v3227_v54  ;;  %v257_v63 = vmul.f32 %v3230_v55, %v3230_v55 }
 0x11c   :  { %v3239_v0 = vsub.f32 %v3164_v10, %v226_v60  ;;  %v3242_v1 = vsub.f32 %v3166_v11, %v227_v61  ;;  %v280_v2 = vsel %vm170_vm0, %v256_v62, 0.0  ;;  %v283_v5 = vsel %vm170_vm0, %v257_v63, 0.0 }
 0x11d   :  { %278 = vadd.xlane.f32.xlu1 %v277_v59  ;;  %281 = vadd.xlane.f32.xlu0 %v280_v2  ;;  %v197_v3 = vpop.xlane.xlu0 %196  ;;  %v200_v4 = vpop.xlane.xlu1 %199  ;;  %v380_v61 = vlaneseq }
 0x11e   :  { %v228_v6 = vmul.f32 0.03125, %v197_v3  ;;  %v229_v7 = vmul.f32 0.03125, %v200_v4  ;;  %v258_v8 = vmul.f32 %v3239_v0, %v3239_v0  ;;  %v259_v9 = vmul.f32 %v3242_v1, %v3242_v1 }
 0x120   :  { %v3251_v10 = vsub.f32 %v3176_v16, %v228_v6  ;;  %v3254_v11 = vsub.f32 %v3178_v17, %v229_v7  ;;  %v286_v12 = vsel %vm170_vm0, %v258_v8, 0.0  ;;  %v289_v15 = vsel %vm170_vm0, %v259_v9, 0.0 }
 0x121   :  { %284 = vadd.xlane.f32.xlu1 %v283_v5  ;;  %287 = vadd.xlane.f32.xlu0 %v286_v12  ;;  %v203_v13 = vpop.xlane.xlu0 %202  ;;  %v206_v14 = vpop.xlane.xlu1 %205  ;;  %v3300_v6 = vshrl.u32 %v380_v61, 7 }
 0x122   :  { %v230_v18 = vmul.f32 0.03125, %v203_v13  ;;  %v231_v19 = vmul.f32 0.03125, %v206_v14  ;;  %v260_v22 = vmul.f32 %v3251_v10, %v3251_v10  ;;  %v261_v16 = vmul.f32 %v3254_v11, %v3254_v11 }
 0x124   :  { %v3263_v23 = vsub.f32 %v3184_v20, %v230_v18  ;;  %v3266_v17 = vsub.f32 %v3186_v21, %v231_v19  ;;  %v292_v26 = vsel %vm170_vm0, %v260_v22, 0.0  ;;  %v295_v31 = vsel %vm170_vm0, %v261_v16, 0.0  ;;  %v3305_v22 = vld [vmem:[#allocation10] sm:$0xff] }
 0x125   :  { %290 = vadd.xlane.f32.xlu1 %v289_v15  ;;  %293 = vadd.xlane.f32.xlu0 %v292_v26  ;;  %v209_v27 = vpop.xlane.xlu0 %208  ;;  %v212_v30 = vpop.xlane.xlu1 %211  ;;  %v3303_v15 = vsub.s32 0, %v3300_v6 }
 0x126   :  { %v232_v32 = vmul.f32 0.03125, %v209_v27  ;;  %v233_v33 = vmul.f32 0.03125, %v212_v30  ;;  %v262_v34 = vmul.f32 %v3263_v23, %v3263_v23  ;;  %v263_v20 = vmul.f32 %v3266_v17, %v3266_v17 }
 0x128   :  { %v3275_v35 = vsub.f32 %v3192_v24, %v232_v32  ;;  %v3278_v21 = vsub.f32 %v3194_v25, %v233_v33  ;;  %v298_v38 = vsel %vm170_vm0, %v262_v34, 0.0  ;;  %v301_v41 = vsel %vm170_vm0, %v263_v20, 0.0 }
 0x129   :  { %296 = vadd.xlane.f32.xlu1 %v295_v31  ;;  %299 = vadd.xlane.f32.xlu0 %v298_v38  ;;  %v215_v39 = vpop.xlane.xlu0 %214  ;;  %v218_v40 = vpop.xlane.xlu1 %217  ;;  %v3310_v33 = vrot.slane %v3305_v22, %v3303_v15  ;;  %v402_v34 = vsub.s32 1, %v3300_v6 }
 0x12a   :  { %v234_v42 = vmul.f32 0.03125, %v215_v39  ;;  %v235_v43 = vmul.f32 0.03125, %v218_v40  ;;  %v264_v46 = vmul.f32 %v3275_v35, %v3275_v35  ;;  %v265_v24 = vmul.f32 %v3278_v21, %v3278_v21 }
 0x12c   :  { %v3287_v47 = vsub.f32 %v3200_v28, %v234_v42  ;;  %v3290_v25 = vsub.f32 %v3202_v29, %v235_v43  ;;  %v304_v48 = vsel %vm170_vm0, %v264_v46, 0.0  ;;  %v307_v49 = vsel %vm170_vm0, %v265_v24, 0.0  ;;  %v2610_v29 = vld [vmem:[#allocation11] sm:$0xff]  }
 0x12d   :  { %302 = vadd.xlane.f32.xlu1 %v301_v41  ;;  %305 = vadd.xlane.f32.xlu0 %v304_v48  ;;  %v3316_v48 = vrot.slane %v3305_v22, %v402_v34 }
 0x12e   :  { %v266_v50 = vmul.f32 %v3287_v47, %v3287_v47  ;;  %v267_v51 = vmul.f32 %v3290_v25, %v3290_v25  ;;  %2462 = vmatprep.subr.bf16.mxu0 %v2610_v29  ;;  %2590 = vmatprep.subr.bf16.mxu1 %v2610_v29 }
 0x12f   :  { %2463 = vmatpush3.bf16.msra.mxu0 %v2610_v29  ;;  %2592 = vmatpush3.bf16.msra.mxu1 %v2610_v29 }
 0x130   :  { %v310_v52 = vsel %vm170_vm0, %v266_v50, 0.0  ;;  %v313_v28 = vsel %vm170_vm0, %v267_v51, 0.0  ;;  %2464 = vmatprep.subr.bf16.mxu0 %v2611_v53  ;;  %2591 = vmatprep.subr.bf16.mxu1 %v2611_v53 }
 0x131   :  { %308 = vadd.xlane.f32.xlu1 %v307_v49  ;;  %311 = vadd.xlane.f32.xlu0 %v310_v52 }
 0x133   :  { %2465 = vmatpush3.bf16.msra.mxu0 %v2611_v53  ;;  %2593 = vmatpush3.bf16.msra.mxu1 %v2611_v53 }
 0x135   :  { %314 = vadd.xlane.f32.xlu1 %v313_v28 }
 0x1a2   :  { %v270_v56 = vpop.xlane.xlu0 %269 }
 0x1a3   :  { %v316_v57 = vmul.f32 0.03125, %v270_v56 }
 0x1a5   :  { %v332_v58 = vadd.f32 1e-05, %v316_v57 }
 0x1a6   :  { %v273_v59 = vpop.xlane.xlu1 %272  ;;  %v276_v60 = vpop.xlane.xlu0 %275 }
 0x1a7   :  { %2624 = vrsqrt.f32 %v332_v58  ;;  %v317_v62 = vmul.f32 0.03125, %v273_v59  ;;  %v318_v63 = vmul.f32 0.03125, %v276_v60 }
 0x1a9   :  { %v333_v2 = vadd.f32 1e-05, %v317_v62  ;;  %v334_v3 = vadd.f32 1e-05, %v318_v63 }
 0x1aa   :  { %v279_v4 = vpop.xlane.xlu1 %278  ;;  %v282_v5 = vpop.xlane.xlu0 %281 }
 0x1ab   :  { %2626 = vrsqrt.f32 %v333_v2  ;;  %v319_v7 = vmul.f32 0.03125, %v279_v4  ;;  %v320_v8 = vmul.f32 0.03125, %v282_v5 }
 0x1ac   :  { %2628 = vrsqrt.f32 %v334_v3 }
 0x1ad   :  { %v335_v9 = vadd.f32 1e-05, %v319_v7  ;;  %v336_v12 = vadd.f32 1e-05, %v320_v8 }
 0x1ae   :  { %v285_v13 = vpop.xlane.xlu1 %284  ;;  %v288_v14 = vpop.xlane.xlu0 %287 }
 0x1af   :  { %2630 = vrsqrt.f32 %v335_v9  ;;  %v321_v18 = vmul.f32 0.03125, %v285_v13  ;;  %v322_v19 = vmul.f32 0.03125, %v288_v14 }
 0x1b0   :  { %2632 = vrsqrt.f32 %v336_v12 }
 0x1b1   :  { %v2625_v16 = vpop.eup %2624  ;;  %v337_v26 = vadd.f32 1e-05, %v321_v18  ;;  %v338_v27 = vadd.f32 1e-05, %v322_v19 }
 0x1b2   :  { %v291_v30 = vpop.xlane.xlu1 %290  ;;  %v294_v31 = vpop.xlane.xlu0 %293  ;;  %v364_v32 = vmul.f32 %v2625_v16, %v3208_v36 }
 0x1b3   :  { %2634 = vrsqrt.f32 %v337_v26  ;;  %v323_v20 = vmul.f32 0.03125, %v291_v30  ;;  %v324_v38 = vmul.f32 0.03125, %v294_v31 }
 0x1b4   :  { %2636 = vrsqrt.f32 %v338_v27  ;;  %v384_v36 = vmul.f32 %v3310_v33, %v364_v32 }
 0x1b5   :  { %v2627_v39 = vpop.eup %2626  ;;  %v339_v40 = vadd.f32 1e-05, %v323_v20  ;;  %v340_v41 = vadd.f32 1e-05, %v324_v38 }
 0x1b6   :  { %v2629_v42 = vpop.eup %2628  ;;  %v297_v43 = vpop.xlane.xlu1 %296  ;;  %v365_v24 = vmul.f32 %v2627_v39, %v3216_v44  ;;  %v404_v59 = vadd.f32 %v3316_v48, %v384_v36 }
 0x1b7   :  { %v300_v46 = vpop.xlane.xlu0 %299  ;;  %v366_v49 = vmul.f32 %v2629_v42, %v3210_v37  ;;  %2638 = vrsqrt.f32 %v339_v40  ;;  %v325_v50 = vmul.f32 0.03125, %v297_v43 }
 0x1b8   :  { %v326_v51 = vmul.f32 0.03125, %v300_v46  ;;  %2640 = vrsqrt.f32 %v340_v41  ;;  %v385_v52 = vmul.f32 %v3310_v33, %v365_v24 }
 0x1b9   :  { %v2631_v28 = vpop.eup %2630  ;;  %v341_v29 = vadd.f32 1e-05, %v325_v50  ;;  %v386_v37 = vmul.f32 %v3310_v33, %v366_v49 }
 0x1ba   :  { %v342_v53 = vadd.f32 1e-05, %v326_v51  ;;  %v2633_v56 = vpop.eup %2632  ;;  %v367_v57 = vmul.f32 %v2631_v28, %v3218_v45  ;;  %v303_v44 = vpop.xlane.xlu1 %302  ;;  %v405_v60 = vadd.f32 %v3316_v48, %v385_v52 }
 0x1bb   :  { %v306_v58 = vpop.xlane.xlu0 %305  ;;  %v368_v61 = vmul.f32 %v2633_v56, %v3227_v54  ;;  %2642 = vrsqrt.f32 %v341_v29  ;;  %v327_v62 = vmul.f32 0.03125, %v303_v44  ;;  %v406_v13 = vadd.f32 %v3316_v48, %v386_v37 }
 0x1bc   :  { %v328_v63 = vmul.f32 0.03125, %v306_v58  ;;  %2644 = vrsqrt.f32 %v342_v53  ;;  %v420_v2 = vpack.c.bf16 %v405_v60, %v404_v59  ;;  %v387_v3 = vmul.f32 %v3310_v33, %v367_v57 }
 0x1bd   :  { %v2635_v4 = vpop.eup %2634  ;;  %v343_v5 = vadd.f32 1e-05, %v327_v62  ;;  %v388_v14 = vmul.f32 %v3310_v33, %v368_v61 }
 0x1be   :  { %v344_v45 = vadd.f32 1e-05, %v328_v63  ;;  %v2637_v7 = vpop.eup %2636  ;;  %v369_v8 = vmul.f32 %v2635_v4, %v3230_v55  ;;  %v309_v9 = vpop.xlane.xlu1 %308  ;;  %2466 = vmatprep.mubr.msk.bf16.mxu0 %vm170_vm0, %v420_v2  ;;  %v407_v54 = vadd.f32 %v3316_v48, %v387_v3 }
 0x1bf   :  { %v312_v12 = vpop.xlane.xlu0 %311  ;;  %v370_v18 = vmul.f32 %v2637_v7, %v3239_v0  ;;  %2646 = vrsqrt.f32 %v343_v5  ;;  %v329_v19 = vmul.f32 0.03125, %v309_v9  ;;  %v408_v38 = vadd.f32 %v3316_v48, %v388_v14  ;;  %v3371_v14 = vld [vmem:[#allocation5 + $0x10] sm:$0xff]  }
 0x1c0   :  { %v330_v16 = vmul.f32 0.03125, %v312_v12  ;;  %2648 = vrsqrt.f32 %v344_v45  ;;  %v421_v26 = vpack.c.bf16 %v407_v54, %v406_v13  ;;  %v389_v27 = vmul.f32 %v3310_v33, %v369_v8  ;;  %v2613_v54 = vld [vmem:[#allocation5 + $0x8] sm:$0xff]  }
 0x1c1   :  { %v2639_v55 = vpop.eup %2638  ;;  %v345_v30 = vadd.f32 1e-05, %v329_v19  ;;  %v390_v39 = vmul.f32 %v3310_v33, %v370_v18 }
 0x1c2   :  { %v346_v31 = vadd.f32 1e-05, %v330_v16  ;;  %v2641_v32 = vpop.eup %2640  ;;  %v371_v34 = vmul.f32 %v2639_v55, %v3242_v1  ;;  %v315_v20 = vpop.xlane.xlu1 %314  ;;  %2467 = vmatmul.mubr.msk.bf16.vlgmr.msra.gmra.mrb[0].mxu0 %vm170_vm0, %v421_v26  ;;  %v409_v0 = vadd.f32 %v3316_v48, %v389_v27 }
 0x1c3   :  { %2650 = vrsqrt.f32 %v345_v30  ;;  %v331_v40 = vmul.f32 0.03125, %v315_v20  ;;  %v372_v41 = vmul.f32 %v2641_v32, %v3251_v10  ;;  %v410_v36 = vadd.f32 %v3316_v48, %v390_v39 }
 0x1c4   :  { %2652 = vrsqrt.f32 %v346_v31  ;;  %v422_v42 = vpack.c.bf16 %v409_v0, %v408_v38  ;;  %v391_v43 = vmul.f32 %v3310_v33, %v371_v34 }
 0x1c5   :  { %v2643_v46 = vpop.eup %2642  ;;  %v347_v24 = vadd.f32 1e-05, %v331_v40  ;;  %v392_v51 = vmul.f32 %v3310_v33, %v372_v41 }
 0x1c6   :  { %v2645_v1 = vpop.eup %2644  ;;  %2470 = vmatprep.mubr.msk.bf16.mxu0 %vm170_vm0, %v422_v42  ;;  %v411_v49 = vadd.f32 %v3316_v48, %v391_v43  ;;  %v373_v50 = vmul.f32 %v2643_v46, %v3254_v11 }
 0x1c7   :  { %v374_v52 = vmul.f32 %v2645_v1, %v3263_v23  ;;  %2654 = vrsqrt.f32 %v347_v24  ;;  %v412_v57 = vadd.f32 %v3316_v48, %v392_v51 }
 0x1c8   :  { %v423_v10 = vpack.c.bf16 %v411_v49, %v410_v36  ;;  %v393_v28 = vmul.f32 %v3310_v33, %v373_v50 }
 0x1c9   :  { %v2647_v29 = vpop.eup %2646  ;;  %v394_v11 = vmul.f32 %v3310_v33, %v374_v52 }
 0x1ca   :  { %v2649_v53 = vpop.eup %2648  ;;  %v375_v56 = vmul.f32 %v2647_v29, %v3266_v17  ;;  %2471 = vmatmul.mubr.msk.bf16.gmra.mrb[4].mxu0 %vm170_vm0, %v423_v10  ;;  %v413_v44 = vadd.f32 %v3316_v48, %v393_v28 }
 0x1cb   :  { %v376_v58 = vmul.f32 %v2649_v53, %v3275_v35  ;;  %v414_v17 = vadd.f32 %v3316_v48, %v394_v11 }
 0x1cc   :  { %v424_v59 = vpack.c.bf16 %v413_v44, %v412_v57  ;;  %v395_v23 = vmul.f32 %v3310_v33, %v375_v56 }
 0x1cd   :  { %v2651_v60 = vpop.eup %2650  ;;  %v396_v63 = vmul.f32 %v3310_v33, %v376_v58 }
 0x1ce   :  { %v2653_v37 = vpop.eup %2652  ;;  %v377_v61 = vmul.f32 %v2651_v60, %v3278_v21  ;;  %2474 = vmatprep.mubr.msk.bf16.mxu1 %vm170_vm0, %v424_v59  ;;  %v415_v62 = vadd.f32 %v3316_v48, %v395_v23 }
 0x1cf   :  { %v378_v2 = vmul.f32 %v2653_v37, %v3287_v47  ;;  %v416_v21 = vadd.f32 %v3316_v48, %v396_v63 }
 0x1d0   :  { %v425_v3 = vpack.c.bf16 %v415_v62, %v414_v17  ;;  %v397_v35 = vmul.f32 %v3310_v33, %v377_v61 }
 0x1d1   :  { %v2655_v4 = vpop.eup %2654  ;;  %v398_v7 = vmul.f32 %v3310_v33, %v378_v2 }
 0x1d2   :  { %v379_v5 = vmul.f32 %v2655_v4, %v3290_v25  ;;  %2475 = vmatmul.mubr.msk.bf16.vlgmr.msra.gmra.mrb[0].mxu1 %vm170_vm0, %v425_v3  ;;  %v417_v45 = vadd.f32 %v3316_v48, %v397_v35  ;;  %v2612_v25 = vld [vmem:[#allocation5] sm:$0xff]  }
 0x1d3   :  { %v418_v47 = vadd.f32 %v3316_v48, %v398_v7  ;;  %2482 = vmatprep.subr.bf16.mxu1 %v2612_v25 }
 0x1d4   :  { %v426_v8 = vpack.c.bf16 %v417_v45, %v416_v21  ;;  %v399_v9 = vmul.f32 %v3310_v33, %v379_v5  ;;  %2483 = vmatpush3.bf16.msra.mxu1 %v2612_v25  ;;  %v430_v33 = vsub.s32 2, %v3300_v6 }
 0x1d5   :  { %2484 = vmatprep.subr.bf16.mxu1 %v2613_v54 }
 0x1d6   :  { %2478 = vmatprep.mubr.msk.bf16.mxu1 %vm170_vm0, %v426_v8  ;;  %v419_v12 = vadd.f32 %v3316_v48, %v399_v9  ;;  %v3376_v18 = vrot.slane %v3305_v22, %v430_v33 }
 0x1d8   :  { %v427_v13 = vpack.c.bf16 %v419_v12, %v418_v47  ;;  %2485 = vmatpush3.bf16.msra.mxu1 %v2613_v54 }
 0x1d9   :  { %2494 = vmatprep.subr.bf16.mxu1 %v3371_v14 }
 0x1da   :  { %2479 = vmatmul.mubr.msk.bf16.gmra.mrb[4].mxu1 %vm170_vm0, %v427_v13 }
 0x295   :  { %v2468_v19 = vpop.f32.mrb[0].mxu0 }
 0x296   :  { %v502_v48 = vpop.f32.mrb[1].mxu0  ;;  %v3382_v55 = vadd.f32 %v2468_v19, %v3376_v18 }
 0x297   :  { %v3379_v16 = vadd.f32 %v502_v48, %v3376_v18  ;;  %v2469_v26 = vpop.f32.mrb[2].mxu0 }
 0x298   :  { %v505_v27 = vpop.f32.mrb[3].mxu0  ;;  %v514_v32 = vadd.f32 %v2469_v26, %v3376_v18  ;;  %v568_v20 = vsel %vm170_vm0, %v3382_v55, 0.0 }
 0x299   :  { %v506_v30 = vadd.f32 %v505_v27, %v3376_v18  ;;  %v565_v31 = vsel %vm170_vm0, %v3379_v16, 0.0 }
 0x29a   :  { %v570_v40 = vsel %vm170_vm0, %v514_v32, 0.0 }
 0x29b   :  { %v566_v22 = vsel %vm170_vm0, %v506_v30, 0.0 }
 0x29c   :  { %v567_v34 = vadd.f32 %v566_v22, %v565_v31 }
 0x29d   :  { %v2472_v38 = vpop.f32.mrb[4].mxu0 }
 0x29e   :  { %v569_v0 = vadd.f32 %v568_v20, %v567_v34  ;;  %v518_v39 = vpop.f32.mrb[5].mxu0  ;;  %v527_v24 = vadd.f32 %v2472_v38, %v3376_v18 }
 0x29f   :  { %v519_v41 = vadd.f32 %v518_v39, %v3376_v18  ;;  %v2473_v42 = vpop.f32.mrb[6].mxu0 }
 0x2a0   :  { %v571_v43 = vadd.f32 %v570_v40, %v569_v0  ;;  %v521_v46 = vpop.f32.mrb[7].mxu0  ;;  %v530_v50 = vadd.f32 %v2473_v42, %v3376_v18  ;;  %v576_v10 = vsel %vm170_vm0, %v527_v24, 0.0 }
 0x2a1   :  { %v572_v1 = vsel %vm170_vm0, %v519_v41, 0.0  ;;  %v522_v36 = vadd.f32 %v521_v46, %v3376_v18 }
 0x2a2   :  { %v573_v49 = vadd.f32 %v572_v1, %v571_v43  ;;  %v578_v56 = vsel %vm170_vm0, %v530_v50, 0.0 }
 0x2a3   :  { %v574_v51 = vsel %vm170_vm0, %v522_v36, 0.0 }
 0x2a4   :  { %v575_v52 = vadd.f32 %v574_v51, %v573_v49 }
 0x2a5   :  { %v2476_v28 = vpop.f32.mrb[0].mxu1 }
 0x2a6   :  { %v577_v29 = vadd.f32 %v576_v10, %v575_v52  ;;  %v534_v53 = vpop.f32.mrb[1].mxu1  ;;  %v3404_v59 = vadd.f32 %v2476_v28, %v3376_v18 }
 0x2a7   :  { %v3401_v57 = vadd.f32 %v534_v53, %v3376_v18  ;;  %v2477_v44 = vpop.f32.mrb[2].mxu1 }
 0x2a8   :  { %v579_v11 = vadd.f32 %v578_v56, %v577_v29  ;;  %v537_v58 = vpop.f32.mrb[3].mxu1  ;;  %v3412_v61 = vadd.f32 %v2477_v44, %v3376_v18  ;;  %v589_v2 = vsel %vm170_vm0, %v3404_v59, 0.0 }
 0x2a9   :  { %v3407_v23 = vadd.f32 %v537_v58, %v3376_v18  ;;  %v586_v37 = vsel %vm170_vm0, %v3401_v57, 0.0 }
 0x2aa   :  { %v580_v60 = vrot.slane %v579_v11, 4  ;;  %v591_v21 = vsel %vm170_vm0, %v3412_v61, 0.0 }
 0x2ab   :  { %v587_v17 = vsel %vm170_vm0, %v3407_v23, 0.0 }
 0x2ac   :  { %v581_v62 = vadd.f32 %v580_v60, %v579_v11  ;;  %v588_v63 = vadd.f32 %v587_v17, %v586_v37 }
 0x2ad   :  { %v2480_v3 = vpop.f32.mrb[4].mxu1 }
 0x2ae   :  { %v582_v35 = vrot.slane %v581_v62, 2  ;;  %v590_v4 = vadd.f32 %v589_v2, %v588_v63  ;;  %v550_v5 = vpop.f32.mrb[5].mxu1  ;;  %v559_v12 = vadd.f32 %v2480_v3, %v3376_v18 }
 0x2af   :  { %v3421_v45 = vadd.f32 %v550_v5, %v3376_v18  ;;  %v2481_v7 = vpop.f32.mrb[6].mxu1 }
 0x2b0   :  { %v583_v8 = vadd.f32 %v582_v35, %v581_v62  ;;  %v592_v9 = vadd.f32 %v591_v21, %v590_v4  ;;  %v553_v47 = vpop.f32.mrb[7].mxu1  ;;  %v597_v27 = vsel %vm170_vm0, %v559_v12, 0.0  ;;  %v562_v34 = vadd.f32 %v2481_v7, %v3376_v18 }
 0x2b1   :  { %v593_v13 = vsel %vm170_vm0, %v3421_v45, 0.0  ;;  %v554_v25 = vadd.f32 %v553_v47, %v3376_v18 }
 0x2b2   :  { %v584_v54 = vrot.slane %v583_v8, 1  ;;  %v594_v33 = vadd.f32 %v593_v13, %v592_v9  ;;  %v599_v1 = vsel %vm170_vm0, %v562_v34, 0.0 }
 0x2b3   :  { %v595_v19 = vsel %vm170_vm0, %v554_v25, 0.0 }
 0x2b4   :  { %v585_v48 = vadd.f32 %v584_v54, %v583_v8  ;;  %v596_v26 = vadd.f32 %v595_v19, %v594_v33 }
 0x2b6   :  { %v608_v31 = vmul.f32 0.015625, %v585_v48  ;;  %v598_v22 = vadd.f32 %v597_v27, %v596_v26 }
 0x2b8   :  { %v3431_v20 = vsub.f32 %v3379_v16, %v608_v31  ;;  %v3433_v38 = vsub.f32 %v506_v30, %v608_v31  ;;  %v3436_v0 = vsub.f32 %v3382_v55, %v608_v31  ;;  %v3438_v39 = vsub.f32 %v514_v32, %v608_v31 }
 0x2b9   :  { %v3440_v40 = vsub.f32 %v519_v41, %v608_v31  ;;  %v3442_v42 = vsub.f32 %v522_v36, %v608_v31  ;;  %v3444_v43 = vsub.f32 %v527_v24, %v608_v31  ;;  %v3446_v46 = vsub.f32 %v530_v50, %v608_v31 }
 0x2ba   :  { %v626_v18 = vmul.f32 %v3431_v20, %v3431_v20  ;;  %v627_v16 = vmul.f32 %v3433_v38, %v3433_v38  ;;  %v628_v55 = vmul.f32 %v3436_v0, %v3436_v0  ;;  %v629_v30 = vmul.f32 %v3438_v39, %v3438_v39 }
 0x2bb   :  { %v630_v36 = vmul.f32 %v3440_v40, %v3440_v40  ;;  %v600_v50 = vadd.f32 %v599_v1, %v598_v22  ;;  %v631_v52 = vmul.f32 %v3442_v42, %v3442_v42  ;;  %v632_v53 = vmul.f32 %v3444_v43, %v3444_v43 }
 0x2bc   :  { %v642_v32 = vsel %vm170_vm0, %v626_v18, 0.0  ;;  %v643_v41 = vsel %vm170_vm0, %v627_v16, 0.0  ;;  %v645_v49 = vsel %vm170_vm0, %v628_v55, 0.0  ;;  %v647_v10 = vsel %vm170_vm0, %v629_v30, 0.0 }
 0x2bd   :  { %v644_v24 = vadd.f32 %v643_v41, %v642_v32  ;;  %v601_v28 = vrot.slane %v600_v50, 4  ;;  %v649_v56 = vsel %vm170_vm0, %v630_v36, 0.0  ;;  %v633_v58 = vmul.f32 %v3446_v46, %v3446_v46 }
 0x2be   :  { %v651_v60 = vsel %vm170_vm0, %v631_v52, 0.0  ;;  %v653_v62 = vsel %vm170_vm0, %v632_v53, 0.0 }
 0x2bf   :  { %v646_v51 = vadd.f32 %v645_v49, %v644_v24  ;;  %v602_v44 = vadd.f32 %v601_v28, %v600_v50  ;;  %v655_v3 = vsel %vm170_vm0, %v633_v58, 0.0 }
 0x2c1   :  { %v648_v29 = vadd.f32 %v647_v10, %v646_v51  ;;  %v603_v37 = vrot.slane %v602_v44, 2 }
 0x2c3   :  { %v650_v11 = vadd.f32 %v649_v56, %v648_v29  ;;  %v604_v63 = vadd.f32 %v603_v37, %v602_v44 }
 0x2c5   :  { %v652_v17 = vadd.f32 %v651_v60, %v650_v11  ;;  %v605_v35 = vrot.slane %v604_v63, 1 }
 0x2c7   :  { %v654_v2 = vadd.f32 %v653_v62, %v652_v17  ;;  %v606_v5 = vadd.f32 %v605_v35, %v604_v63 }
 0x2c9   :  { %v656_v4 = vadd.f32 %v655_v3, %v654_v2  ;;  %v609_v7 = vmul.f32 0.015625, %v606_v5 }
 0x2cb   :  { %v657_v21 = vrot.slane %v656_v4, 4  ;;  %v3474_v9 = vsub.f32 %v3401_v57, %v609_v7  ;;  %v3477_v47 = vsub.f32 %v3407_v23, %v609_v7  ;;  %v3480_v13 = vsub.f32 %v3404_v59, %v609_v7 }
 0x2cc   :  { %v3483_v54 = vsub.f32 %v3412_v61, %v609_v7  ;;  %v3486_v19 = vsub.f32 %v3421_v45, %v609_v7  ;;  %v3488_v48 = vsub.f32 %v554_v25, %v609_v7  ;;  %v3490_v26 = vsub.f32 %v559_v12, %v609_v7 }
 0x2cd   :  { %v658_v8 = vadd.f32 %v657_v21, %v656_v4  ;;  %v3492_v27 = vsub.f32 %v562_v34, %v609_v7  ;;  %v634_v57 = vmul.f32 %v3474_v9, %v3474_v9  ;;  %v635_v59 = vmul.f32 %v3477_v47, %v3477_v47 }
 0x2ce   :  { %v636_v23 = vmul.f32 %v3480_v13, %v3480_v13  ;;  %v637_v45 = vmul.f32 %v3483_v54, %v3483_v54  ;;  %v638_v34 = vmul.f32 %v3486_v19, %v3486_v19  ;;  %v639_v30 = vmul.f32 %v3488_v48, %v3488_v48 }
 0x2cf   :  { %v659_v33 = vrot.slane %v658_v8, 2  ;;  %v663_v25 = vsel %vm170_vm0, %v634_v57, 0.0  ;;  %v664_v12 = vsel %vm170_vm0, %v635_v59, 0.0  ;;  %v640_v1 = vmul.f32 %v3490_v26, %v3490_v26 }
 0x2d0   :  { %v665_v22 = vadd.f32 %v664_v12, %v663_v25  ;;  %v666_v18 = vsel %vm170_vm0, %v636_v23, 0.0  ;;  %v668_v32 = vsel %vm170_vm0, %v637_v45, 0.0  ;;  %v670_v36 = vsel %vm170_vm0, %v638_v34, 0.0 }
 0x2d1   :  { %v660_v61 = vadd.f32 %v659_v33, %v658_v8  ;;  %v641_v51 = vmul.f32 %v3492_v27, %v3492_v27  ;;  %v672_v52 = vsel %vm170_vm0, %v639_v30, 0.0  ;;  %v674_v28 = vsel %vm170_vm0, %v640_v1, 0.0 }
 0x2d2   :  { %v667_v55 = vadd.f32 %v666_v18, %v665_v22 }
 0x2d3   :  { %v661_v31 = vrot.slane %v660_v61, 1  ;;  %v676_v53 = vsel %vm170_vm0, %v641_v51, 0.0 }
 0x2d4   :  { %v669_v24 = vadd.f32 %v668_v32, %v667_v55 }
 0x2d5   :  { %v662_v16 = vadd.f32 %v661_v31, %v660_v61 }
 0x2d6   :  { %v671_v50 = vadd.f32 %v670_v36, %v669_v24 }
 0x2d7   :  { %v684_v41 = vmul.f32 0.015625, %v662_v16 }
 0x2d8   :  { %v673_v10 = vadd.f32 %v672_v52, %v671_v50 }
 0x2d9   :  { %v686_v49 = vadd.f32 1e-05, %v684_v41 }
 0x2da   :  { %v675_v29 = vadd.f32 %v674_v28, %v673_v10 }
 0x2db   :  { %2656 = vrsqrt.f32 %v686_v49 }
 0x2dc   :  { %v677_v56 = vadd.f32 %v676_v53, %v675_v29  ;;  %v148_v53 = vld [vmem:[#allocation8 + $0x1] sm:$0x1] }
 0x2de   :  { %v678_v44 = vrot.slane %v677_v56, 4 }
 0x2e0   :  { %v679_v11 = vadd.f32 %v678_v44, %v677_v56 }
 0x2e2   :  { %v680_v60 = vrot.slane %v679_v11, 2 }
 0x2e4   :  { %v681_v2 = vadd.f32 %v680_v60, %v679_v11 }
 0x2e5   :  { %v2657_v58 = vpop.eup %2656 }
 0x2e6   :  { %v693_v37 = vmul.f32 %v2657_v58, %v3438_v39  ;;  %v694_v17 = vmul.f32 %v2657_v58, %v3440_v40  ;;  %v695_v62 = vmul.f32 %v2657_v58, %v3442_v42  ;;  %v690_v63 = vmul.f32 %v2657_v58, %v3431_v20  ;;  %v2615_v39 = vld [vmem:[#allocation5 + $0x18] sm:$0xff]  }
 0x2e7   :  { %v691_v3 = vmul.f32 %v2657_v58, %v3433_v38  ;;  %v692_v35 = vmul.f32 %v2657_v58, %v3436_v0  ;;  %v696_v4 = vmul.f32 %v2657_v58, %v3444_v43  ;;  %v697_v21 = vmul.f32 %v2657_v58, %v3446_v46 }
 0x2e8   :  { %v708_v5 = vpack.c.bf16 %v695_v62, %v694_v17  ;;  %v682_v7 = vrot.slane %v681_v2, 1  ;;  %v909_v62 = vmul.f32 10000.0, %v148_v53 }
 0x2e9   :  { %v706_v8 = vpack.c.bf16 %v691_v3, %v690_v63  ;;  %v707_v33 = vpack.c.bf16 %v693_v37, %v692_v35  ;;  %v709_v57 = vpack.c.bf16 %v697_v21, %v696_v4 }
 0x2ea   :  { %v683_v40 = vadd.f32 %v682_v7, %v681_v2  ;;  %v2357_v35 = vadd.f32 -10000.0, %v909_v62 }
 0x2eb   :  { %2486 = vmatprep.mubr.msk.bf16.mxu1 %vm170_vm0, %v706_v8 }
 0x2ec   :  { %2487 = vmatmul.mubr.msk.bf16.vlgmr.msra.gmra.mrb[8].mxu1 %vm170_vm0, %v707_v33  ;;  %v685_v20 = vmul.f32 0.015625, %v683_v40  ;;  %v921_v21 = vrot.slane %v2357_v35, %v3303_v15 }
 0x2ed   :  { %2495 = vmatpush3.bf16.msra.mxu1 %v3371_v14  ;;  %2490 = vmatprep.mubr.msk.bf16.mxu1 %vm170_vm0, %v708_v5 }
 0x2ee   :  { %2496 = vmatprep.subr.bf16.mxu1 %v2615_v39  ;;  %v687_v38 = vadd.f32 1e-05, %v685_v20 }
 0x2f0   :  { %2658 = vrsqrt.f32 %v687_v38 }
 0x2f1   :  { %2497 = vmatpush3.bf16.msra.mxu1 %v2615_v39 }
 0x2f4   :  { %2491 = vmatmul.mubr.msk.bf16.gmra.mrb[12].mxu1 %vm170_vm0, %v709_v57 }
 0x2fa   :  { %v2659_v0 = vpop.eup %2658 }
 0x2fb   :  { %v701_v42 = vmul.f32 %v2659_v0, %v3483_v54  ;;  %v702_v43 = vmul.f32 %v2659_v0, %v3486_v19  ;;  %v703_v46 = vmul.f32 %v2659_v0, %v3488_v48  ;;  %v698_v59 = vmul.f32 %v2659_v0, %v3474_v9  ;;  %v147_v9 = vld [vmem:[#allocation8] sm:$0x1] }
 0x2fc   :  { %v699_v23 = vmul.f32 %v2659_v0, %v3477_v47  ;;  %v700_v14 = vmul.f32 %v2659_v0, %v3480_v13  ;;  %v704_v61 = vmul.f32 %v2659_v0, %v3490_v26  ;;  %v705_v45 = vmul.f32 %v2659_v0, %v3492_v27 }
 0x2fd   :  { %v712_v25 = vpack.c.bf16 %v703_v46, %v702_v43  ;;  %v908_v47 = vmul.f32 10000.0, %v147_v9 }
 0x2fe   :  { %v710_v12 = vpack.c.bf16 %v699_v23, %v698_v59  ;;  %v711_v31 = vpack.c.bf16 %v701_v42, %v700_v14  ;;  %v713_v22 = vpack.c.bf16 %v705_v45, %v704_v61 }
 0x2ff   :  { %v2356_v54 = vadd.f32 -10000.0, %v908_v47 }
 0x300   :  { %2498 = vmatprep.mubr.msk.bf16.mxu1 %vm170_vm0, %v710_v12 }
 0x301   :  { %2499 = vmatmul.mubr.msk.bf16.vlgmr.msra.gmra.mrb[16].mxu1 %vm170_vm0, %v711_v31  ;;  %v917_v19 = vrot.slane %v2356_v54, %v3303_v15 }
 0x302   :  { %2502 = vmatprep.mubr.msk.bf16.mxu1 %vm170_vm0, %v712_v25 }
 0x309   :  { %2503 = vmatmul.mubr.msk.bf16.gmra.mrb[20].mxu1 %vm170_vm0, %v713_v22 }
 0x3bf   :  { %v2488_v13 = vpop.f32.mrb[8].mxu1 }
 0x3c0   :  { %v772_v48 = vpop.f32.mrb[9].mxu1  ;;  %v894_v26 = vmul.f32 0.17677669, %v2488_v13 }
 0x3c1   :  { %v892_v27 = vmul.f32 0.17677669, %v772_v48  ;;  %v2489_v34 = vpop.f32.mrb[10].mxu1 }
 0x3c2   :  { %v775_v18 = vpop.f32.mrb[11].mxu1  ;;  %v895_v16 = vmul.f32 0.17677669, %v2489_v34  ;;  %v3550_v24 = vadd.f32 %v917_v19, %v894_v26 }
 0x3c3   :  { %v893_v55 = vmul.f32 0.17677669, %v775_v18  ;;  %v3544_v30 = vadd.f32 %v917_v19, %v892_v27 }
 0x3c4   :  { %v3554_v49 = vadd.f32 %v917_v19, %v895_v16  ;;  %v947_v28 = vsel %vm940_vm1, %v3550_v24, -inf }
 0x3c5   :  { %v941_v32 = vsel %vm940_vm1, %v3544_v30, -inf  ;;  %v3548_v41 = vadd.f32 %v917_v19, %v893_v55 }
 0x3c6   :  { %942 = vmax.xlane.f32.xlu0 %v941_v32  ;;  %v950_v11 = vsel %vm940_vm1, %v3554_v49, -inf }
 0x3c7   :  { %v2492_v1 = vpop.f32.mrb[12].mxu1  ;;  %v944_v36 = vsel %vm940_vm1, %v3548_v41, -inf }
 0x3c8   :  { %945 = vmax.xlane.f32.xlu1 %v944_v36  ;;  %v788_v50 = vpop.f32.mrb[13].mxu1  ;;  %v898_v51 = vmul.f32 0.17677669, %v2492_v1 }
 0x3c9   :  { %v896_v52 = vmul.f32 0.17677669, %v788_v50  ;;  %v2493_v10 = vpop.f32.mrb[14].mxu1 }
 0x3ca   :  { %948 = vmax.xlane.f32.xlu0 %v947_v28  ;;  %v791_v29 = vpop.f32.mrb[15].mxu1  ;;  %v899_v56 = vmul.f32 0.17677669, %v2493_v10  ;;  %v3566_v17 = vadd.f32 %v917_v19, %v898_v51 }
 0x3cb   :  { %v897_v44 = vmul.f32 0.17677669, %v791_v29  ;;  %v3560_v58 = vadd.f32 %v917_v19, %v896_v52 }
 0x3cc   :  { %951 = vmax.xlane.f32.xlu1 %v950_v11  ;;  %v3570_v2 = vadd.f32 %v917_v19, %v899_v56  ;;  %v959_v3 = vsel %vm940_vm1, %v3566_v17, -inf }
 0x3cd   :  { %v953_v60 = vsel %vm940_vm1, %v3560_v58, -inf  ;;  %v3564_v37 = vadd.f32 %v917_v19, %v897_v44 }
 0x3ce   :  { %954 = vmax.xlane.f32.xlu0 %v953_v60  ;;  %v962_v4 = vsel %vm940_vm1, %v3570_v2, -inf }
 0x3cf   :  { %v956_v63 = vsel %vm940_vm1, %v3564_v37, -inf }
 0x3d0   :  { %957 = vmax.xlane.f32.xlu1 %v956_v63 }
 0x3d2   :  { %960 = vmax.xlane.f32.xlu0 %v959_v3 }
 0x3d4   :  { %963 = vmax.xlane.f32.xlu1 %v962_v4  ;;  %v2500_v5 = vpop.f32.mrb[16].mxu1 }
 0x3d5   :  { %v861_v7 = vpop.f32.mrb[17].mxu1  ;;  %v902_v8 = vmul.f32 0.17677669, %v2500_v5 }
 0x3d6   :  { %v900_v33 = vmul.f32 0.17677669, %v861_v7  ;;  %v2501_v39 = vpop.f32.mrb[18].mxu1 }
 0x3d7   :  { %v864_v57 = vpop.f32.mrb[19].mxu1  ;;  %v903_v40 = vmul.f32 0.17677669, %v2501_v39  ;;  %v3583_v43 = vadd.f32 %v921_v21, %v902_v8 }
 0x3d8   :  { %v901_v20 = vmul.f32 0.17677669, %v864_v57  ;;  %v3577_v38 = vadd.f32 %v921_v21, %v900_v33 }
 0x3d9   :  { %v3587_v59 = vadd.f32 %v921_v21, %v903_v40  ;;  %v971_v25 = vsel %vm940_vm1, %v3583_v43, -inf }
 0x3da   :  { %v965_v0 = vsel %vm940_vm1, %v3577_v38, -inf  ;;  %v3581_v42 = vadd.f32 %v921_v21, %v901_v20 }
 0x3db   :  { %966 = vmax.xlane.f32.xlu0 %v965_v0  ;;  %v974_v9 = vsel %vm940_vm1, %v3587_v59, -inf }
 0x3dc   :  { %v2504_v46 = vpop.f32.mrb[20].mxu1  ;;  %v968_v15 = vsel %vm940_vm1, %v3581_v42, -inf }
 0x3dd   :  { %969 = vmax.xlane.f32.xlu1 %v968_v15  ;;  %v877_v23 = vpop.f32.mrb[21].mxu1  ;;  %v906_v14 = vmul.f32 0.17677669, %v2504_v46 }
 0x3de   :  { %v904_v61 = vmul.f32 0.17677669, %v877_v23  ;;  %v2505_v45 = vpop.f32.mrb[22].mxu1 }
 0x3df   :  { %972 = vmax.xlane.f32.xlu0 %v971_v25  ;;  %v880_v12 = vpop.f32.mrb[23].mxu1  ;;  %v907_v31 = vmul.f32 0.17677669, %v2505_v45  ;;  %v3599_v19 = vadd.f32 %v921_v21, %v906_v14 }
 0x3e0   :  { %v905_v22 = vmul.f32 0.17677669, %v880_v12  ;;  %v3593_v47 = vadd.f32 %v921_v21, %v904_v61 }
 0x3e1   :  { %975 = vmax.xlane.f32.xlu1 %v974_v9  ;;  %v3603_v26 = vadd.f32 %v921_v21, %v907_v31  ;;  %v983_v27 = vsel %vm940_vm1, %v3599_v19, -inf }
 0x3e2   :  { %v977_v54 = vsel %vm940_vm1, %v3593_v47, -inf  ;;  %v3597_v13 = vadd.f32 %v921_v21, %v905_v22 }
 0x3e3   :  { %978 = vmax.xlane.f32.xlu0 %v977_v54  ;;  %v986_v34 = vsel %vm940_vm1, %v3603_v26, -inf }
 0x3e4   :  { %v980_v48 = vsel %vm940_vm1, %v3597_v13, -inf }
 0x3e5   :  { %981 = vmax.xlane.f32.xlu1 %v980_v48 }
 0x3e7   :  { %984 = vmax.xlane.f32.xlu0 %v983_v27 }
 0x3e9   :  { %987 = vmax.xlane.f32.xlu1 %v986_v34 }
 0x453   :  { %v943_v18 = vpop.xlane.xlu0 %942 }
 0x454   :  { %v989_v16 = vsub.f32 %v3544_v30, %v943_v18 }
 0x455   :  { %v946_v55 = vpop.xlane.xlu1 %945 }
 0x456   :  { %v1005_v32 = vmul.f32 1.442695, %v989_v16  ;;  %v990_v1 = vsub.f32 %v3548_v41, %v946_v55 }
 0x457   :  { %v949_v36 = vpop.xlane.xlu0 %948 }
 0x458   :  { %2660 = vpow2.f32 %v1005_v32  ;;  %v1007_v50 = vmul.f32 1.442695, %v990_v1  ;;  %v991_v51 = vsub.f32 %v3550_v24, %v949_v36 }
 0x459   :  { %v952_v52 = vpop.xlane.xlu1 %951 }
 0x45a   :  { %2662 = vpow2.f32 %v1007_v50  ;;  %v1009_v10 = vmul.f32 1.442695, %v991_v51  ;;  %v992_v28 = vsub.f32 %v3554_v49, %v952_v52 }
 0x45b   :  { %v955_v29 = vpop.xlane.xlu0 %954 }
 0x45c   :  { %2664 = vpow2.f32 %v1009_v10  ;;  %v1011_v53 = vmul.f32 1.442695, %v992_v28  ;;  %v993_v56 = vsub.f32 %v3560_v58, %v955_v29  ;;  %v145_v29 = vld [vmem:[#allocation7] sm:$0xf] }
 0x45d   :  { %v958_v30 = vpop.xlane.xlu1 %957  ;;  %2594 = vmatprep.subr.msk.bf16.mxu0 %vm1137_vm2, %v145_v29 }
 0x45e   :  { %2666 = vpow2.f32 %v1011_v53  ;;  %v1013_v44 = vmul.f32 1.442695, %v993_v56  ;;  %v994_v41 = vsub.f32 %v3564_v37, %v958_v30  ;;  %v1139_v56 = vsel %vm1137_vm2, %v145_v29, 0 }
 0x45f   :  { %v961_v11 = vpop.xlane.xlu0 %960  ;;  %2507 = vmatpush3.bf16.msra.mxu0 %v1139_v56 }
 0x460   :  { %2668 = vpow2.f32 %v1013_v44  ;;  %v1015_v60 = vmul.f32 1.442695, %v994_v41  ;;  %v995_v24 = vsub.f32 %v3566_v17, %v961_v11 }
 0x461   :  { %v964_v62 = vpop.xlane.xlu1 %963 }
 0x462   :  { %v3616_v63 = vpop.eup %2660  ;;  %2670 = vpow2.f32 %v1015_v60  ;;  %v1017_v49 = vmul.f32 1.442695, %v995_v24  ;;  %v996_v3 = vsub.f32 %v3570_v2, %v964_v62  ;;  %v146_v24 = vld [vmem:[#allocation7 + $0x4] sm:$0xf] }
 0x463   :  { %v1037_v58 = vsel %vm940_vm1, %v3616_v63, 0.0  ;;  %2595 = vmatprep.subr.msk.bf16.mxu1 %vm1137_vm2, %v146_v24  ;;  %v1219_v62 = vsel %vm1137_vm2, %v146_v24, 0 }
 0x464   :  { %v3621_v35 = vpop.eup %2662  ;;  %2672 = vpow2.f32 %v1017_v49  ;;  %v1019_v4 = vmul.f32 1.442695, %v996_v3  ;;  %1038 = vadd.xlane.f32.xlu0 %v1037_v58  ;;  %2517 = vmatpush3.bf16.msra.mxu1 %v1219_v62  ;;  %v2616_v49 = vld [vmem:[#allocation11 + $0x10] sm:$0xff]  }
 0x465   :  { %v1040_v37 = vsel %vm940_vm1, %v3621_v35, 0.0  ;;  %2526 = vmatprep.subr.bf16.mxu0 %v2616_v49 }
 0x466   :  { %v3625_v5 = vpop.eup %2664  ;;  %2674 = vpow2.f32 %v1019_v4  ;;  %1041 = vadd.xlane.f32.xlu1 %v1040_v37 }
 0x467   :  { %v1043_v17 = vsel %vm940_vm1, %v3625_v5, 0.0 }
 0x468   :  { %v3629_v21 = vpop.eup %2666  ;;  %1044 = vadd.xlane.f32.xlu0 %v1043_v17  ;;  %v967_v2 = vpop.xlane.xlu0 %966 }
 0x469   :  { %v1046_v7 = vsel %vm940_vm1, %v3629_v21, 0.0  ;;  %v997_v33 = vsub.f32 %v3577_v38, %v967_v2 }
 0x46a   :  { %v3633_v8 = vpop.eup %2668  ;;  %1047 = vadd.xlane.f32.xlu1 %v1046_v7  ;;  %v970_v39 = vpop.xlane.xlu1 %969 }
 0x46b   :  { %v1049_v57 = vsel %vm940_vm1, %v3633_v8, 0.0  ;;  %v1021_v20 = vmul.f32 1.442695, %v997_v33  ;;  %v998_v0 = vsub.f32 %v3581_v42, %v970_v39 }
 0x46c   :  { %v3638_v40 = vpop.eup %2670  ;;  %1050 = vadd.xlane.f32.xlu0 %v1049_v57  ;;  %v973_v46 = vpop.xlane.xlu0 %972 }
 0x46d   :  { %v1052_v15 = vsel %vm940_vm1, %v3638_v40, 0.0  ;;  %2676 = vpow2.f32 %v1021_v20  ;;  %v1023_v14 = vmul.f32 1.442695, %v998_v0  ;;  %v999_v38 = vsub.f32 %v3583_v43, %v973_v46 }
 0x46e   :  { %v3643_v23 = vpop.eup %2672  ;;  %1053 = vadd.xlane.f32.xlu1 %v1052_v15  ;;  %v976_v61 = vpop.xlane.xlu1 %975 }
 0x46f   :  { %v1055_v45 = vsel %vm940_vm1, %v3643_v23, 0.0  ;;  %2678 = vpow2.f32 %v1023_v14  ;;  %v1025_v42 = vmul.f32 1.442695, %v999_v38  ;;  %v1000_v12 = vsub.f32 %v3587_v59, %v976_v61 }
 0x470   :  { %v3648_v25 = vpop.eup %2674  ;;  %1056 = vadd.xlane.f32.xlu0 %v1055_v45  ;;  %v979_v31 = vpop.xlane.xlu0 %978 }
 0x471   :  { %v1058_v22 = vsel %vm940_vm1, %v3648_v25, 0.0  ;;  %2680 = vpow2.f32 %v1025_v42  ;;  %v1027_v9 = vmul.f32 1.442695, %v1000_v12  ;;  %v1001_v43 = vsub.f32 %v3593_v47, %v979_v31  ;;  %v2617_v12 = vld [vmem:[#allocation11 + $0x18] sm:$0xff]  }
 0x472   :  { %1059 = vadd.xlane.f32.xlu1 %v1058_v22  ;;  %v982_v54 = vpop.xlane.xlu1 %981 }
 0x473   :  { %2682 = vpow2.f32 %v1027_v9  ;;  %v1029_v48 = vmul.f32 1.442695, %v1001_v43  ;;  %v1002_v27 = vsub.f32 %v3597_v13, %v982_v54 }
 0x474   :  { %v985_v34 = vpop.xlane.xlu0 %984 }
 0x475   :  { %2684 = vpow2.f32 %v1029_v48  ;;  %v1031_v18 = vmul.f32 1.442695, %v1002_v27  ;;  %v1003_v59 = vsub.f32 %v3599_v19, %v985_v34 }
 0x476   :  { %v988_v16 = vpop.xlane.xlu1 %987 }
 0x477   :  { %v3656_v55 = vpop.eup %2676  ;;  %2686 = vpow2.f32 %v1031_v18  ;;  %v1033_v32 = vmul.f32 1.442695, %v1003_v59  ;;  %v1004_v1 = vsub.f32 %v3603_v26, %v988_v16 }
 0x478   :  { %v1061_v47 = vsel %vm940_vm1, %v3656_v55, 0.0 }
 0x479   :  { %v3661_v36 = vpop.eup %2678  ;;  %2688 = vpow2.f32 %v1033_v32  ;;  %v1035_v50 = vmul.f32 1.442695, %v1004_v1  ;;  %1062 = vadd.xlane.f32.xlu0 %v1061_v47 }
 0x47a   :  { %v1064_v13 = vsel %vm940_vm1, %v3661_v36, 0.0 }
 0x47b   :  { %v3665_v51 = vpop.eup %2680  ;;  %2690 = vpow2.f32 %v1035_v50  ;;  %1065 = vadd.xlane.f32.xlu1 %v1064_v13 }
 0x47c   :  { %v1067_v19 = vsel %vm940_vm1, %v3665_v51, 0.0 }
 0x47d   :  { %v3669_v52 = vpop.eup %2682  ;;  %1068 = vadd.xlane.f32.xlu0 %v1067_v19 }
 0x47e   :  { %v1070_v26 = vsel %vm940_vm1, %v3669_v52, 0.0 }
 0x47f   :  { %v3673_v10 = vpop.eup %2684  ;;  %1071 = vadd.xlane.f32.xlu1 %v1070_v26 }
 0x480   :  { %v1073_v28 = vsel %vm940_vm1, %v3673_v10, 0.0 }
 0x481   :  { %v3677_v53 = vpop.eup %2686  ;;  %1074 = vadd.xlane.f32.xlu0 %v1073_v28 }
 0x482   :  { %v1076_v30 = vsel %vm940_vm1, %v3677_v53, 0.0 }
 0x483   :  { %v3683_v44 = vpop.eup %2688  ;;  %1077 = vadd.xlane.f32.xlu1 %v1076_v30 }
 0x484   :  { %v1079_v41 = vsel %vm940_vm1, %v3683_v44, 0.0 }
 0x485   :  { %v3687_v11 = vpop.eup %2690  ;;  %1080 = vadd.xlane.f32.xlu0 %v1079_v41 }
 0x486   :  { %v1082_v60 = vsel %vm940_vm1, %v3687_v11, 0.0 }
 0x487   :  { %1083 = vadd.xlane.f32.xlu1 %v1082_v60 }
 0x4f1   :  { %v1039_v3 = vpop.xlane.xlu0 %1038 }
 0x4f2   :  { %2692 = vrcp.f32 %v1039_v3 }
 0x4f3   :  { %v1042_v58 = vpop.xlane.xlu1 %1041 }
 0x4f4   :  { %2694 = vrcp.f32 %v1042_v58 }
 0x4f5   :  { %v1045_v4 = vpop.xlane.xlu0 %1044 }
 0x4f6   :  { %2696 = vrcp.f32 %v1045_v4 }
 0x4f7   :  { %v1048_v37 = vpop.xlane.xlu1 %1047 }
 0x4f8   :  { %2698 = vrcp.f32 %v1048_v37 }
 0x4f9   :  { %v1051_v17 = vpop.xlane.xlu0 %1050 }
 0x4fa   :  { %2700 = vrcp.f32 %v1051_v17 }
 0x4fb   :  { %v1054_v2 = vpop.xlane.xlu1 %1053 }
 0x4fc   :  { %v2693_v7 = vpop.eup %2692  ;;  %2702 = vrcp.f32 %v1054_v2 }
 0x4fd   :  { %v1057_v33 = vpop.xlane.xlu0 %1056  ;;  %v1101_v20 = vmul.f32 %v2693_v7, %v3616_v63 }
 0x4fe   :  { %v2695_v39 = vpop.eup %2694  ;;  %2704 = vrcp.f32 %v1057_v33 }
 0x4ff   :  { %v1060_v57 = vpop.xlane.xlu1 %1059  ;;  %v1102_v0 = vmul.f32 %v2695_v39, %v3621_v35 }
 0x500   :  { %v2697_v46 = vpop.eup %2696  ;;  %2706 = vrcp.f32 %v1060_v57 }
 0x501   :  { %v1117_v15 = vpack.c.bf16 %v1102_v0, %v1101_v20  ;;  %v1103_v38 = vmul.f32 %v2697_v46, %v3625_v5 }
 0x502   :  { %v2699_v14 = vpop.eup %2698 }
 0x503   :  { %v1104_v61 = vmul.f32 %v2699_v14, %v3629_v21  ;;  %2508 = vmatprep.mubr.msk.bf16.mxu0 %vm940_vm1, %v1117_v15 }
 0x504   :  { %v2701_v45 = vpop.eup %2700 }
 0x505   :  { %v1118_v42 = vpack.c.bf16 %v1104_v61, %v1103_v38  ;;  %v1105_v63 = vmul.f32 %v2701_v45, %v3633_v8 }
 0x506   :  { %v2703_v31 = vpop.eup %2702  ;;  %v1063_v22 = vpop.xlane.xlu0 %1062 }
 0x507   :  { %2509 = vmatmul.mubr.msk.bf16.vlgmr.msra.gmra.mrb[8].mxu0 %vm940_vm1, %v1118_v42  ;;  %v1106_v35 = vmul.f32 %v2703_v31, %v3638_v40  ;;  %2708 = vrcp.f32 %v1063_v22  ;;  %v1296_v42 = vsub.s32 3, %v3300_v6 }
 0x508   :  { %v2705_v9 = vpop.eup %2704  ;;  %2527 = vmatpush3.bf16.msra.mxu0 %v2616_v49  ;;  %v1066_v43 = vpop.xlane.xlu1 %1065 }
 0x509   :  { %v1119_v5 = vpack.c.bf16 %v1106_v35, %v1105_v63  ;;  %2528 = vmatprep.subr.bf16.mxu0 %v2617_v12  ;;  %2710 = vrcp.f32 %v1066_v43  ;;  %v1107_v48 = vmul.f32 %v2705_v9, %v3643_v23 }
 0x50a   :  { %v2707_v21 = vpop.eup %2706  ;;  %v1069_v54 = vpop.xlane.xlu0 %1068 }
 0x50b   :  { %2512 = vmatprep.mubr.msk.bf16.mxu0 %vm940_vm1, %v1119_v5  ;;  %v1108_v27 = vmul.f32 %v2707_v21, %v3648_v25  ;;  %2712 = vrcp.f32 %v1069_v54 }
 0x50c   :  { %2529 = vmatpush3.bf16.msra.mxu0 %v2617_v12  ;;  %v1072_v8 = vpop.xlane.xlu1 %1071  ;;  %v3726_v12 = vld [vmem:[#allocation10] sm:$0xff] }
 0x50d   :  { %v1120_v34 = vpack.c.bf16 %v1108_v27, %v1107_v48  ;;  %2714 = vrcp.f32 %v1072_v8  ;;  %v3729_v31 = vrot.slane %v3726_v12, %v1296_v42 }
 0x50e   :  { %v1075_v40 = vpop.xlane.xlu0 %1074 }
 0x50f   :  { %2513 = vmatmul.mubr.msk.bf16.gmra.mrb[12].mxu0 %vm940_vm1, %v1120_v34  ;;  %2716 = vrcp.f32 %v1075_v40 }
 0x510   :  { %v1078_v18 = vpop.xlane.xlu1 %1077 }
 0x511   :  { %v2709_v59 = vpop.eup %2708  ;;  %2718 = vrcp.f32 %v1078_v18 }
 0x512   :  { %v1081_v16 = vpop.xlane.xlu0 %1080  ;;  %v1109_v23 = vmul.f32 %v2709_v59, %v3656_v55 }
 0x513   :  { %v2711_v32 = vpop.eup %2710  ;;  %2720 = vrcp.f32 %v1081_v16 }
 0x514   :  { %v1084_v1 = vpop.xlane.xlu1 %1083  ;;  %v1110_v25 = vmul.f32 %v2711_v32, %v3661_v36 }
 0x515   :  { %v2713_v47 = vpop.eup %2712  ;;  %2722 = vrcp.f32 %v1084_v1 }
 0x516   :  { %v1121_v50 = vpack.c.bf16 %v1110_v25, %v1109_v23  ;;  %v1111_v19 = vmul.f32 %v2713_v47, %v3665_v51 }
 0x517   :  { %v2715_v13 = vpop.eup %2714 }
 0x518   :  { %v1112_v26 = vmul.f32 %v2715_v13, %v3669_v52  ;;  %2518 = vmatprep.mubr.msk.bf16.mxu1 %vm940_vm1, %v1121_v50 }
 0x519   :  { %v2717_v28 = vpop.eup %2716 }
 0x51a   :  { %v1122_v29 = vpack.c.bf16 %v1112_v26, %v1111_v19  ;;  %v1113_v30 = vmul.f32 %v2717_v28, %v3673_v10 }
 0x51b   :  { %v2719_v56 = vpop.eup %2718 }
 0x51c   :  { %2519 = vmatmul.mubr.msk.bf16.vlgmr.msra.gmra.mrb[24].mxu1 %vm940_vm1, %v1122_v29  ;;  %v1114_v55 = vmul.f32 %v2719_v56, %v3677_v53 }
 0x51d   :  { %v2721_v36 = vpop.eup %2720 }
 0x51e   :  { %v1123_v41 = vpack.c.bf16 %v1114_v55, %v1113_v30  ;;  %v1115_v51 = vmul.f32 %v2721_v36, %v3683_v44 }
 0x51f   :  { %v2723_v60 = vpop.eup %2722 }
 0x520   :  { %2522 = vmatprep.mubr.msk.bf16.mxu1 %vm940_vm1, %v1123_v41  ;;  %v1116_v52 = vmul.f32 %v2723_v60, %v3687_v11 }
 0x522   :  { %v1124_v24 = vpack.c.bf16 %v1116_v52, %v1115_v51 }
 0x524   :  { %2523 = vmatmul.mubr.msk.bf16.gmra.mrb[28].mxu1 %vm940_vm1, %v1124_v24 }
 0x5da   :  { %v2510_v62 = vpop.f32.mrb[8].mxu0 }
 0x5db   :  { %v1175_v49 = vpop.f32.mrb[9].mxu0 }
 0x5dc   :  { %v2511_v3 = vpop.f32.mrb[10].mxu0 }
 0x5dd   :  { %v1287_v58 = vpack.c.bf16 %v2511_v3, %v2510_v62  ;;  %v1178_v4 = vpop.f32.mrb[11].mxu0 }
 0x5de   :  { %v1286_v10 = vpack.c.bf16 %v1178_v4, %v1175_v49 }
 0x5e0   :  { %2530 = vmatprep.mubr.msk.bf16.mxu0 %vm170_vm0, %v1286_v10 }
 0x5e1   :  { %2531 = vmatmul.mubr.msk.bf16.vlgmr.msra.gmra.mrb[16].mxu0 %vm170_vm0, %v1287_v58 }
 0x5e2   :  { %v2514_v53 = vpop.f32.mrb[12].mxu0 }
 0x5e3   :  { %v1191_v37 = vpop.f32.mrb[13].mxu0 }
 0x5e4   :  { %v2515_v17 = vpop.f32.mrb[14].mxu0 }
 0x5e5   :  { %v1289_v2 = vpack.c.bf16 %v2515_v17, %v2514_v53  ;;  %v1194_v44 = vpop.f32.mrb[15].mxu0 }
 0x5e6   :  { %v1288_v7 = vpack.c.bf16 %v1194_v44, %v1191_v37 }
 0x5e8   :  { %2534 = vmatprep.mubr.msk.bf16.mxu0 %vm170_vm0, %v1288_v7 }
 0x5e9   :  { %2535 = vmatmul.mubr.msk.bf16.gmra.mrb[20].mxu0 %vm170_vm0, %v1289_v2 }
 0x5ef   :  { %v2520_v11 = vpop.f32.mrb[24].mxu1 }
 0x5f0   :  { %v1255_v33 = vpop.f32.mrb[25].mxu1 }
 0x5f1   :  { %v2521_v39 = vpop.f32.mrb[26].mxu1 }
 0x5f2   :  { %v1291_v57 = vpack.c.bf16 %v2521_v39, %v2520_v11  ;;  %v1258_v20 = vpop.f32.mrb[27].mxu1 }
 0x5f3   :  { %v1290_v0 = vpack.c.bf16 %v1258_v20, %v1255_v33 }
 0x5f5   :  { %2538 = vmatprep.mubr.msk.bf16.mxu0 %vm170_vm0, %v1290_v0 }
 0x5f6   :  { %2539 = vmatmul.mubr.msk.bf16.gmra.mrb[24].mxu0 %vm170_vm0, %v1291_v57 }
 0x5f7   :  { %v2524_v46 = vpop.f32.mrb[28].mxu1 }
 0x5f8   :  { %v1271_v15 = vpop.f32.mrb[29].mxu1 }
 0x5f9   :  { %v2525_v14 = vpop.f32.mrb[30].mxu1 }
 0x5fa   :  { %v1293_v38 = vpack.c.bf16 %v2525_v14, %v2524_v46  ;;  %v1274_v61 = vpop.f32.mrb[31].mxu1 }
 0x5fb   :  { %v1292_v45 = vpack.c.bf16 %v1274_v61, %v1271_v15 }
 0x5fd   :  { %2542 = vmatprep.mubr.msk.bf16.mxu0 %vm170_vm0, %v1292_v45 }
 0x5fe   :  { %2543 = vmatmul.mubr.msk.bf16.gmra.mrb[28].mxu0 %vm170_vm0, %v1293_v38 }
 0x6b4   :  { %v2532_v22 = vpop.f32.mrb[16].mxu0 }
 0x6b5   :  { %v1368_v63 = vpop.f32.mrb[17].mxu0  ;;  %v1377_v5 = vadd.f32 %v2532_v22, %v3729_v31 }
 0x6b6   :  { %v1369_v35 = vadd.f32 %v1368_v63, %v3729_v31  ;;  %v2533_v9 = vpop.f32.mrb[18].mxu0 }
 0x6b7   :  { %v1371_v43 = vpop.f32.mrb[19].mxu0  ;;  %v1380_v48 = vadd.f32 %v2533_v9, %v3729_v31  ;;  %v1434_v34 = vsel %vm170_vm0, %v1377_v5, 0.0 }
 0x6b8   :  { %v1372_v21 = vadd.f32 %v1371_v43, %v3729_v31  ;;  %v1431_v54 = vsel %vm170_vm0, %v1369_v35, 0.0 }
 0x6b9   :  { %v1436_v16 = vsel %vm170_vm0, %v1380_v48, 0.0 }
 0x6ba   :  { %v1432_v27 = vsel %vm170_vm0, %v1372_v21, 0.0 }
 0x6bb   :  { %v1433_v8 = vadd.f32 %v1432_v27, %v1431_v54 }
 0x6bc   :  { %v2536_v40 = vpop.f32.mrb[20].mxu0 }
 0x6bd   :  { %v1435_v18 = vadd.f32 %v1434_v34, %v1433_v8  ;;  %v1384_v59 = vpop.f32.mrb[21].mxu0  ;;  %v1393_v47 = vadd.f32 %v2536_v40, %v3729_v31 }
 0x6be   :  { %v1385_v32 = vadd.f32 %v1384_v59, %v3729_v31  ;;  %v2537_v1 = vpop.f32.mrb[22].mxu0 }
 0x6bf   :  { %v1437_v23 = vadd.f32 %v1436_v16, %v1435_v18  ;;  %v1387_v25 = vpop.f32.mrb[23].mxu0  ;;  %v1396_v26 = vadd.f32 %v2537_v1, %v3729_v31  ;;  %v1442_v56 = vsel %vm170_vm0, %v1393_v47, 0.0 }
 0x6c0   :  { %v1438_v50 = vsel %vm170_vm0, %v1385_v32, 0.0  ;;  %v1388_v13 = vadd.f32 %v1387_v25, %v3729_v31 }
 0x6c1   :  { %v1439_v19 = vadd.f32 %v1438_v50, %v1437_v23  ;;  %v1444_v55 = vsel %vm170_vm0, %v1396_v26, 0.0 }
 0x6c2   :  { %v1440_v28 = vsel %vm170_vm0, %v1388_v13, 0.0 }
 0x6c3   :  { %v1441_v29 = vadd.f32 %v1440_v28, %v1439_v19 }
 0x6c5   :  { %v1443_v30 = vadd.f32 %v1442_v56, %v1441_v29 }
 0x6c7   :  { %v1445_v36 = vadd.f32 %v1444_v55, %v1443_v30 }
 0x6c9   :  { %v1446_v41 = vrot.slane %v1445_v36, 4  ;;  %v2540_v60 = vpop.f32.mrb[24].mxu0 }
 0x6ca   :  { %v1400_v52 = vpop.f32.mrb[25].mxu0  ;;  %v3751_v58 = vadd.f32 %v2540_v60, %v3729_v31 }
 0x6cb   :  { %v1447_v51 = vadd.f32 %v1446_v41, %v1445_v36  ;;  %v3748_v24 = vadd.f32 %v1400_v52, %v3729_v31  ;;  %v2541_v62 = vpop.f32.mrb[26].mxu0 }
 0x6cc   :  { %v1403_v3 = vpop.f32.mrb[27].mxu0  ;;  %v3759_v37 = vadd.f32 %v2541_v62, %v3729_v31  ;;  %v1455_v7 = vsel %vm170_vm0, %v3751_v58, 0.0 }
 0x6cd   :  { %v1448_v49 = vrot.slane %v1447_v51, 2  ;;  %v3754_v4 = vadd.f32 %v1403_v3, %v3729_v31  ;;  %v1452_v53 = vsel %vm170_vm0, %v3748_v24, 0.0 }
 0x6ce   :  { %v1457_v20 = vsel %vm170_vm0, %v3759_v37, 0.0 }
 0x6cf   :  { %v1449_v10 = vadd.f32 %v1448_v49, %v1447_v51  ;;  %v1453_v17 = vsel %vm170_vm0, %v3754_v4, 0.0 }
 0x6d0   :  { %v1454_v44 = vadd.f32 %v1453_v17, %v1452_v53 }
 0x6d1   :  { %v1450_v2 = vrot.slane %v1449_v10, 1  ;;  %v2544_v11 = vpop.f32.mrb[28].mxu0 }
 0x6d2   :  { %v1456_v39 = vadd.f32 %v1455_v7, %v1454_v44  ;;  %v1416_v57 = vpop.f32.mrb[29].mxu0  ;;  %v1425_v59 = vadd.f32 %v2544_v11, %v3729_v31 }
 0x6d3   :  { %v1451_v33 = vadd.f32 %v1450_v2, %v1449_v10  ;;  %v2545_v0 = vpop.f32.mrb[30].mxu0  ;;  %v1417_v38 = vadd.f32 %v1416_v57, %v3729_v31 }
 0x6d4   :  { %v1458_v15 = vadd.f32 %v1457_v20, %v1456_v39  ;;  %v1419_v14 = vpop.f32.mrb[31].mxu0  ;;  %v1463_v28 = vsel %vm170_vm0, %v1425_v59, 0.0 }
 0x6d5   :  { %v1473_v46 = vmul.f32 0.015625, %v1451_v33 }
 0x6d7   :  { %v3768_v61 = vsub.f32 %v1369_v35, %v1473_v46  ;;  %v3770_v45 = vsub.f32 %v1372_v21, %v1473_v46  ;;  %v3772_v42 = vsub.f32 %v1377_v5, %v1473_v46  ;;  %v3774_v22 = vsub.f32 %v1380_v48, %v1473_v46 }
 0x6d8   :  { %v3776_v63 = vsub.f32 %v1385_v32, %v1473_v46  ;;  %v3778_v9 = vsub.f32 %v1388_v13, %v1473_v46  ;;  %v3780_v43 = vsub.f32 %v1393_v47, %v1473_v46  ;;  %v3782_v54 = vsub.f32 %v1396_v26, %v1473_v46 }
 0x6d9   :  { %v1491_v27 = vmul.f32 %v3768_v61, %v3768_v61  ;;  %v1492_v35 = vmul.f32 %v3770_v45, %v3770_v45  ;;  %v1493_v5 = vmul.f32 %v3772_v42, %v3772_v42  ;;  %v1420_v21 = vadd.f32 %v1419_v14, %v3729_v31 }
 0x6da   :  { %v1459_v48 = vsel %vm170_vm0, %v1417_v38, 0.0  ;;  %v1494_v8 = vmul.f32 %v3774_v22, %v3774_v22  ;;  %v1495_v16 = vmul.f32 %v3776_v63, %v3776_v63  ;;  %v1428_v47 = vadd.f32 %v2545_v0, %v3729_v31 }
 0x6db   :  { %v1507_v34 = vsel %vm170_vm0, %v1491_v27, 0.0  ;;  %v1508_v40 = vsel %vm170_vm0, %v1492_v35, 0.0  ;;  %v1510_v32 = vsel %vm170_vm0, %v1493_v5, 0.0  ;;  %v1460_v1 = vadd.f32 %v1459_v48, %v1458_v15 }
 0x6dc   :  { %v1509_v18 = vadd.f32 %v1508_v40, %v1507_v34  ;;  %v1461_v23 = vsel %vm170_vm0, %v1420_v21, 0.0  ;;  %v1496_v50 = vmul.f32 %v3778_v9, %v3778_v9  ;;  %v1512_v13 = vsel %vm170_vm0, %v1494_v8, 0.0 }
 0x6dd   :  { %v1462_v19 = vadd.f32 %v1461_v23, %v1460_v1  ;;  %v1497_v29 = vmul.f32 %v3780_v43, %v3780_v43  ;;  %v1514_v56 = vsel %vm170_vm0, %v1495_v16, 0.0  ;;  %v1465_v36 = vsel %vm170_vm0, %v1428_v47, 0.0 }
 0x6de   :  { %v1511_v25 = vadd.f32 %v1510_v32, %v1509_v18  ;;  %v1498_v31 = vmul.f32 %v3782_v54, %v3782_v54  ;;  %v1516_v41 = vsel %vm170_vm0, %v1496_v50, 0.0 }
 0x6df   :  { %v1464_v30 = vadd.f32 %v1463_v28, %v1462_v19  ;;  %v1518_v52 = vsel %vm170_vm0, %v1497_v29, 0.0 }
 0x6e0   :  { %v1513_v26 = vadd.f32 %v1512_v13, %v1511_v25  ;;  %v1520_v3 = vsel %vm170_vm0, %v1498_v31, 0.0 }
 0x6e1   :  { %v1466_v60 = vadd.f32 %v1465_v36, %v1464_v30 }
 0x6e2   :  { %v1515_v55 = vadd.f32 %v1514_v56, %v1513_v26 }
 0x6e3   :  { %v1467_v62 = vrot.slane %v1466_v60, 4 }
 0x6e4   :  { %v1517_v51 = vadd.f32 %v1516_v41, %v1515_v55 }
 0x6e5   :  { %v1468_v10 = vadd.f32 %v1467_v62, %v1466_v60 }
 0x6e6   :  { %v1519_v49 = vadd.f32 %v1518_v52, %v1517_v51 }
 0x6e7   :  { %v1469_v17 = vrot.slane %v1468_v10, 2 }
 0x6e8   :  { %v1521_v53 = vadd.f32 %v1520_v3, %v1519_v49 }
 0x6e9   :  { %v1470_v44 = vadd.f32 %v1469_v17, %v1468_v10 }
 0x6ea   :  { %v1522_v2 = vrot.slane %v1521_v53, 4 }
 0x6eb   :  { %v1471_v11 = vrot.slane %v1470_v44, 1 }
 0x6ec   :  { %v1523_v7 = vadd.f32 %v1522_v2, %v1521_v53  ;;  %v2793_v53 = vld [vmem:[#allocation2 + $0x8] sm:$0xff]  ;;  %v2794_v2 = vld [vmem:[#allocation2] sm:$0xff] }
 0x6ed   :  { %v1472_v39 = vadd.f32 %v1471_v11, %v1470_v44 }
 0x6ee   :  { %v1524_v33 = vrot.slane %v1523_v7, 2 }
 0x6ef   :  { %v1474_v20 = vmul.f32 0.015625, %v1472_v39 }
 0x6f0   :  { %v1525_v57 = vadd.f32 %v1524_v33, %v1523_v7 }
 0x6f1   :  { %v3816_v46 = vsub.f32 %v3748_v24, %v1474_v20  ;;  %v3819_v15 = vsub.f32 %v3754_v4, %v1474_v20  ;;  %v3822_v14 = vsub.f32 %v3751_v58, %v1474_v20  ;;  %v3825_v27 = vsub.f32 %v3759_v37, %v1474_v20 }
 0x6f2   :  { %v1526_v0 = vrot.slane %v1525_v57, 1  ;;  %v3827_v5 = vsub.f32 %v1417_v38, %v1474_v20  ;;  %v3829_v48 = vsub.f32 %v1420_v21, %v1474_v20  ;;  %v3831_v8 = vsub.f32 %v1425_v59, %v1474_v20 }
 0x6f3   :  { %v3833_v34 = vsub.f32 %v1428_v47, %v1474_v20  ;;  %v1499_v24 = vmul.f32 %v3816_v46, %v3816_v46  ;;  %v1500_v4 = vmul.f32 %v3819_v15, %v3819_v15  ;;  %v1501_v58 = vmul.f32 %v3822_v14, %v3822_v14  ;;  %v2797_v20 = vld [vmem:[#allocation2 + $0x28] sm:$0xff] }
 0x6f4   :  { %v1527_v35 = vadd.f32 %v1526_v0, %v1525_v57  ;;  %v1502_v38 = vmul.f32 %v3825_v27, %v3825_v27  ;;  %v1503_v16 = vmul.f32 %v3827_v5, %v3827_v5  ;;  %v1504_v23 = vmul.f32 %v3829_v48, %v3829_v48 }
 0x6f5   :  { %v1528_v21 = vsel %vm170_vm0, %v1499_v24, 0.0  ;;  %v1529_v40 = vsel %vm170_vm0, %v1500_v4, 0.0  ;;  %v1531_v32 = vsel %vm170_vm0, %v1501_v58, 0.0  ;;  %v1505_v50 = vmul.f32 %v3831_v8, %v3831_v8 }
 0x6f6   :  { %v1549_v37 = vmul.f32 0.015625, %v1527_v35  ;;  %v1530_v59 = vadd.f32 %v1529_v40, %v1528_v21  ;;  %v1533_v25 = vsel %vm170_vm0, %v1502_v38, 0.0  ;;  %v1535_v13 = vsel %vm170_vm0, %v1503_v16, 0.0  ;;  %v2798_v35 = vld [vmem:[#allocation2 + $0x20] sm:$0xff]  ;;  %v2799_v38 = vld [vmem:[#allocation2 + $0x38] sm:$0xff]  ;;  %v2800_v40 = vld [vmem:[#allocation2 + $0x30] sm:$0xff] }
 0x6f7   :  { %v1506_v26 = vmul.f32 %v3833_v34, %v3833_v34  ;;  %v1537_v28 = vsel %vm170_vm0, %v1504_v23, 0.0  ;;  %v1539_v56 = vsel %vm170_vm0, %v1505_v50, 0.0 }
 0x6f8   :  { %v1551_v18 = vadd.f32 1e-05, %v1549_v37  ;;  %v1532_v1 = vadd.f32 %v1531_v32, %v1530_v59 }
 0x6f9   :  { %v1541_v55 = vsel %vm170_vm0, %v1506_v26, 0.0 }
 0x6fa   :  { %2724 = vrsqrt.f32 %v1551_v18  ;;  %v1534_v47 = vadd.f32 %v1533_v25, %v1532_v1 }
 0x6fc   :  { %v1536_v19 = vadd.f32 %v1535_v13, %v1534_v47 }
 0x6fe   :  { %v1538_v29 = vadd.f32 %v1537_v28, %v1536_v19 }
 0x700   :  { %v1540_v30 = vadd.f32 %v1539_v56, %v1538_v29  ;;  %v2801_v56 = vld [vmem:[#allocation2 + $0x48] sm:$0xff] }
 0x702   :  { %v1542_v31 = vadd.f32 %v1541_v55, %v1540_v30  ;;  %v2802_v55 = vld [vmem:[#allocation2 + $0x40] sm:$0xff] }
 0x704   :  { %v2725_v36 = vpop.eup %2724  ;;  %v1543_v62 = vrot.slane %v1542_v31, 4 }
 0x705   :  { %v1560_v41 = vmul.f32 %v2725_v36, %v3778_v9  ;;  %v1556_v60 = vmul.f32 %v2725_v36, %v3770_v45  ;;  %v1555_v51 = vmul.f32 %v2725_v36, %v3768_v61  ;;  %v1558_v52 = vmul.f32 %v2725_v36, %v3774_v22  ;;  %v2795_v22 = vld [vmem:[#allocation2 + $0x18] sm:$0xff] }
 0x706   :  { %v1557_v49 = vmul.f32 %v2725_v36, %v3772_v42  ;;  %v1559_v3 = vmul.f32 %v2725_v36, %v3776_v63  ;;  %v1562_v10 = vmul.f32 %v2725_v36, %v3782_v54  ;;  %v1544_v9 = vadd.f32 %v1543_v62, %v1542_v31  ;;  %v2796_v42 = vld [vmem:[#allocation2 + $0x10] sm:$0xff]  ;;  %v2805_v31 = vld [vmem:[#allocation2 + $0x68] sm:$0xff] }
 0x707   :  { %v3866_v17 = vadd.f32 %v2793_v53, %v1556_v60  ;;  %v3868_v44 = vadd.f32 %v2794_v2, %v1555_v51  ;;  %v3874_v7 = vadd.f32 %v2795_v22, %v1558_v52  ;;  %v1561_v11 = vmul.f32 %v2725_v36, %v3780_v43  ;;  %v2806_v60 = vld [vmem:[#allocation2 + $0x60] sm:$0xff] }
 0x708   :  { %v3876_v63 = vadd.f32 %v2796_v42, %v1557_v49  ;;  %v1545_v54 = vrot.slane %v1544_v9, 2  ;;  %v3883_v0 = vadd.f32 %v2797_v20, %v1560_v41  ;;  %v3885_v24 = vadd.f32 %v2798_v35, %v1559_v3  ;;  %v2807_v49 = vld [vmem:[#allocation2 + $0x78] sm:$0xff] }
 0x709   :  { %v1590_v45 = vsel %vm170_vm0, %v3866_v17, 0.0  ;;  %v1587_v61 = vsel %vm170_vm0, %v3868_v44, 0.0  ;;  %v1596_v39 = vsel %vm170_vm0, %v3874_v7, 0.0  ;;  %v3891_v21 = vadd.f32 %v2799_v38, %v1562_v10  ;;  %v2808_v10 = vld [vmem:[#allocation2 + $0x70] sm:$0xff] }
 0x70a   :  { %1591 = vadd.xlane.f32.xlu1 %v1590_v45  ;;  %1588 = vadd.xlane.f32.xlu0 %v1587_v61  ;;  %v1546_v33 = vadd.f32 %v1545_v54, %v1544_v9  ;;  %v1593_v57 = vsel %vm170_vm0, %v3876_v63, 0.0  ;;  %v1602_v43 = vsel %vm170_vm0, %v3883_v0, 0.0  ;;  %v1599_v37 = vsel %vm170_vm0, %v3885_v24, 0.0 }
 0x70b   :  { %v3893_v18 = vadd.f32 %v2800_v40, %v1561_v11  ;;  %v1608_v32 = vsel %vm170_vm0, %v3891_v21, 0.0 }
 0x70c   :  { %v1547_v4 = vrot.slane %v1546_v33, 1 }
 0x70d   :  { %v1605_v1 = vsel %vm170_vm0, %v3893_v18, 0.0 }
 0x70e   :  { %1597 = vadd.xlane.f32.xlu1 %v1596_v39  ;;  %1594 = vadd.xlane.f32.xlu0 %v1593_v57  ;;  %v1548_v58 = vadd.f32 %v1547_v4, %v1546_v33 }
 0x710   :  { %v1550_v59 = vmul.f32 0.015625, %v1548_v58 }
 0x712   :  { %1603 = vadd.xlane.f32.xlu1 %v1602_v43  ;;  %1600 = vadd.xlane.f32.xlu0 %v1599_v37  ;;  %v1552_v16 = vadd.f32 1e-05, %v1550_v59 }
 0x714   :  { %2726 = vrsqrt.f32 %v1552_v16 }
 0x716   :  { %1609 = vadd.xlane.f32.xlu1 %v1608_v32  ;;  %1606 = vadd.xlane.f32.xlu0 %v1605_v1 }
 0x71e   :  { %v2727_v23 = vpop.eup %2726 }
 0x71f   :  { %v1568_v25 = vmul.f32 %v2727_v23, %v3829_v48  ;;  %v1564_v47 = vmul.f32 %v2727_v23, %v3819_v15  ;;  %v1563_v50 = vmul.f32 %v2727_v23, %v3816_v46  ;;  %v1566_v13 = vmul.f32 %v2727_v23, %v3825_v27  ;;  %v2803_v27 = vld [vmem:[#allocation2 + $0x58] sm:$0xff] }
 0x720   :  { %v1565_v19 = vmul.f32 %v2727_v23, %v3822_v14  ;;  %v1567_v26 = vmul.f32 %v2727_v23, %v3827_v5  ;;  %v1570_v28 = vmul.f32 %v2727_v23, %v3833_v34  ;;  %v1569_v29 = vmul.f32 %v2727_v23, %v3831_v8  ;;  %v2804_v5 = vld [vmem:[#allocation2 + $0x50] sm:$0xff] }
 0x721   :  { %v3907_v30 = vadd.f32 %v2801_v56, %v1564_v47  ;;  %v3909_v36 = vadd.f32 %v2802_v55, %v1563_v50  ;;  %v3915_v14 = vadd.f32 %v2803_v27, %v1566_v13  ;;  %v3923_v41 = vadd.f32 %v2805_v31, %v1568_v25 }
 0x722   :  { %v3917_v48 = vadd.f32 %v2804_v5, %v1565_v19  ;;  %v3925_v51 = vadd.f32 %v2806_v60, %v1567_v26  ;;  %v3931_v3 = vadd.f32 %v2807_v49, %v1570_v28  ;;  %v3933_v53 = vadd.f32 %v2808_v10, %v1569_v29 }
 0x723   :  { %v1614_v15 = vsel %vm170_vm0, %v3907_v30, 0.0  ;;  %v1611_v46 = vsel %vm170_vm0, %v3909_v36, 0.0  ;;  %v1620_v8 = vsel %vm170_vm0, %v3915_v14, 0.0  ;;  %v1626_v52 = vsel %vm170_vm0, %v3923_v41, 0.0 }
 0x724   :  { %1615 = vadd.xlane.f32.xlu1 %v1614_v15  ;;  %1612 = vadd.xlane.f32.xlu0 %v1611_v46  ;;  %v1617_v34 = vsel %vm170_vm0, %v3917_v48, 0.0  ;;  %v1623_v62 = vsel %vm170_vm0, %v3925_v51, 0.0  ;;  %v1632_v2 = vsel %vm170_vm0, %v3931_v3, 0.0  ;;  %v1629_v9 = vsel %vm170_vm0, %v3933_v53, 0.0 }
 0x728   :  { %1621 = vadd.xlane.f32.xlu1 %v1620_v8  ;;  %1618 = vadd.xlane.f32.xlu0 %v1617_v34 }
 0x72c   :  { %1627 = vadd.xlane.f32.xlu1 %v1626_v52  ;;  %1624 = vadd.xlane.f32.xlu0 %v1623_v62 }
 0x730   :  { %1633 = vadd.xlane.f32.xlu1 %v1632_v2  ;;  %1630 = vadd.xlane.f32.xlu0 %v1629_v9 }
 0x797   :  { %v1589_v45 = vpop.xlane.xlu0 %1588  ;;  %v1592_v61 = vpop.xlane.xlu1 %1591 }
 0x798   :  { %v1635_v22 = vmul.f32 0.03125, %v1589_v45  ;;  %v1636_v42 = vmul.f32 0.03125, %v1592_v61 }
 0x79a   :  { %v3940_v54 = vsub.f32 %v3868_v44, %v1635_v22  ;;  %v3943_v11 = vsub.f32 %v3866_v17, %v1636_v42 }
 0x79b   :  { %v1595_v33 = vpop.xlane.xlu0 %1594  ;;  %v1598_v39 = vpop.xlane.xlu1 %1597 }
 0x79c   :  { %v1637_v57 = vmul.f32 0.03125, %v1595_v33  ;;  %v1638_v20 = vmul.f32 0.03125, %v1598_v39  ;;  %v1667_v35 = vmul.f32 %v3940_v54, %v3940_v54  ;;  %v1668_v4 = vmul.f32 %v3943_v11, %v3943_v11 }
 0x79e   :  { %v3950_v58 = vsub.f32 %v3876_v63, %v1637_v57  ;;  %v3953_v43 = vsub.f32 %v3874_v7, %v1638_v20  ;;  %v1683_v37 = vsel %vm170_vm0, %v1667_v35, 0.0  ;;  %v1686_v38 = vsel %vm170_vm0, %v1668_v4, 0.0 }
 0x79f   :  { %v1601_v40 = vpop.xlane.xlu0 %1600  ;;  %1684 = vadd.xlane.f32.xlu0 %v1683_v37  ;;  %1687 = vadd.xlane.f32.xlu1 %v1686_v38  ;;  %v1604_v59 = vpop.xlane.xlu1 %1603 }
 0x7a0   :  { %v1639_v16 = vmul.f32 0.03125, %v1601_v40  ;;  %v1640_v32 = vmul.f32 0.03125, %v1604_v59  ;;  %v1669_v1 = vmul.f32 %v3950_v58, %v3950_v58  ;;  %v1670_v23 = vmul.f32 %v3953_v43, %v3953_v43 }
 0x7a2   :  { %v3962_v25 = vsub.f32 %v3885_v24, %v1639_v16  ;;  %v3965_v47 = vsub.f32 %v3883_v0, %v1640_v32  ;;  %v1689_v50 = vsel %vm170_vm0, %v1669_v1, 0.0  ;;  %v1692_v13 = vsel %vm170_vm0, %v1670_v23, 0.0 }
 0x7a3   :  { %v1607_v19 = vpop.xlane.xlu0 %1606  ;;  %1690 = vadd.xlane.f32.xlu0 %v1689_v50  ;;  %1693 = vadd.xlane.f32.xlu1 %v1692_v13  ;;  %v1610_v26 = vpop.xlane.xlu1 %1609 }
 0x7a4   :  { %v1641_v28 = vmul.f32 0.03125, %v1607_v19  ;;  %v1642_v29 = vmul.f32 0.03125, %v1610_v26  ;;  %v1671_v56 = vmul.f32 %v3962_v25, %v3962_v25  ;;  %v1672_v55 = vmul.f32 %v3965_v47, %v3965_v47 }
 0x7a6   :  { %v3974_v15 = vsub.f32 %v3893_v18, %v1641_v28  ;;  %v3977_v46 = vsub.f32 %v3891_v21, %v1642_v29  ;;  %v1695_v27 = vsel %vm170_vm0, %v1671_v56, 0.0  ;;  %v1698_v5 = vsel %vm170_vm0, %v1672_v55, 0.0 }
 0x7a7   :  { %1696 = vadd.xlane.f32.xlu0 %v1695_v27  ;;  %1699 = vadd.xlane.f32.xlu1 %v1698_v5 }
 0x7a8   :  { %v1673_v8 = vmul.f32 %v3974_v15, %v3974_v15  ;;  %v1674_v34 = vmul.f32 %v3977_v46, %v3977_v46 }
 0x7aa   :  { %v1701_v31 = vsel %vm170_vm0, %v1673_v8, 0.0  ;;  %v1704_v60 = vsel %vm170_vm0, %v1674_v34, 0.0 }
 0x7ab   :  { %1702 = vadd.xlane.f32.xlu0 %v1701_v31  ;;  %1705 = vadd.xlane.f32.xlu1 %v1704_v60 }
 0x7b1   :  { %v1613_v52 = vpop.xlane.xlu0 %1612  ;;  %v1616_v62 = vpop.xlane.xlu1 %1615 }
 0x7b2   :  { %v1643_v49 = vmul.f32 0.03125, %v1613_v52  ;;  %v1644_v10 = vmul.f32 0.03125, %v1616_v62  ;;  %v2618_v52 = vld [vmem:[#allocation13] sm:$0xff]  }
 0x7b3   :  { %2546 = vmatprep.subr.bf16.mxu1 %v2618_v52 }
 0x7b4   :  { %v3988_v2 = vsub.f32 %v3909_v36, %v1643_v49  ;;  %v3991_v9 = vsub.f32 %v3907_v30, %v1644_v10  ;;  %2547 = vmatpush3.bf16.msra.mxu1 %v2618_v52  ;;  %v2619_v10 = vld [vmem:[#allocation13 + $0x8] sm:$0xff]  }
 0x7b5   :  { %v1619_v45 = vpop.xlane.xlu0 %1618  ;;  %v1622_v61 = vpop.xlane.xlu1 %1621  ;;  %2548 = vmatprep.subr.bf16.mxu1 %v2619_v10 }
 0x7b6   :  { %v1645_v22 = vmul.f32 0.03125, %v1619_v45  ;;  %v1646_v42 = vmul.f32 0.03125, %v1622_v61  ;;  %v1675_v33 = vmul.f32 %v3988_v2, %v3988_v2  ;;  %v1676_v39 = vmul.f32 %v3991_v9, %v3991_v9 }
 0x7b8   :  { %v3998_v57 = vsub.f32 %v3917_v48, %v1645_v22  ;;  %v4001_v20 = vsub.f32 %v3915_v14, %v1646_v42  ;;  %v1707_v35 = vsel %vm170_vm0, %v1675_v33, 0.0  ;;  %v1710_v4 = vsel %vm170_vm0, %v1676_v39, 0.0  ;;  %2549 = vmatpush3.bf16.msra.mxu1 %v2619_v10 }
 0x7b9   :  { %1708 = vadd.xlane.f32.xlu0 %v1707_v35  ;;  %v1625_v37 = vpop.xlane.xlu0 %1624  ;;  %1711 = vadd.xlane.f32.xlu1 %v1710_v4  ;;  %v1628_v38 = vpop.xlane.xlu1 %1627 }
 0x7ba   :  { %v1647_v40 = vmul.f32 0.03125, %v1625_v37  ;;  %v1648_v59 = vmul.f32 0.03125, %v1628_v38  ;;  %v1677_v16 = vmul.f32 %v3998_v57, %v3998_v57  ;;  %v1678_v32 = vmul.f32 %v4001_v20, %v4001_v20 }
 0x7bc   :  { %v4010_v1 = vsub.f32 %v3925_v51, %v1647_v40  ;;  %v4013_v23 = vsub.f32 %v3923_v41, %v1648_v59  ;;  %v1713_v50 = vsel %vm170_vm0, %v1677_v16, 0.0  ;;  %v1716_v13 = vsel %vm170_vm0, %v1678_v32, 0.0 }
 0x7bd   :  { %1714 = vadd.xlane.f32.xlu0 %v1713_v50  ;;  %v1631_v19 = vpop.xlane.xlu0 %1630  ;;  %1717 = vadd.xlane.f32.xlu1 %v1716_v13  ;;  %v1634_v26 = vpop.xlane.xlu1 %1633 }
 0x7be   :  { %v1649_v28 = vmul.f32 0.03125, %v1631_v19  ;;  %v1650_v29 = vmul.f32 0.03125, %v1634_v26  ;;  %v1679_v56 = vmul.f32 %v4010_v1, %v4010_v1  ;;  %v1680_v55 = vmul.f32 %v4013_v23, %v4013_v23 }
 0x7bf   :  { %v1797_v19 = vsub.s32 4, %v3300_v6 }
 0x7c0   :  { %v4022_v27 = vsub.f32 %v3933_v53, %v1649_v28  ;;  %v4025_v5 = vsub.f32 %v3931_v3, %v1650_v29  ;;  %v1719_v8 = vsel %vm170_vm0, %v1679_v56, 0.0  ;;  %v1722_v34 = vsel %vm170_vm0, %v1680_v55, 0.0 }
 0x7c1   :  { %1720 = vadd.xlane.f32.xlu0 %v1719_v8  ;;  %1723 = vadd.xlane.f32.xlu1 %v1722_v34  ;;  %v1817_v29 = vsub.s32 5, %v3300_v6 }
 0x7c2   :  { %v1681_v31 = vmul.f32 %v4022_v27, %v4022_v27  ;;  %v1682_v60 = vmul.f32 %v4025_v5, %v4025_v5 }
 0x7c4   :  { %v1725_v62 = vsel %vm170_vm0, %v1681_v31, 0.0  ;;  %v1728_v49 = vsel %vm170_vm0, %v1682_v60, 0.0  ;;  %v4038_v31 = vrot.slane %v3726_v12, %v1797_v19 }
 0x7c5   :  { %1726 = vadd.xlane.f32.xlu0 %v1725_v62  ;;  %1729 = vadd.xlane.f32.xlu1 %v1728_v49 }
 0x82c   :  { %v1685_v45 = vpop.xlane.xlu0 %1684  ;;  %v1688_v61 = vpop.xlane.xlu1 %1687 }
 0x82d   :  { %v1731_v22 = vmul.f32 0.03125, %v1685_v45  ;;  %v1732_v42 = vmul.f32 0.03125, %v1688_v61  ;;  %v4042_v45 = vrot.slane %v3726_v12, %v1817_v29 }
 0x82f   :  { %v1747_v33 = vadd.f32 1e-05, %v1731_v22  ;;  %v1748_v39 = vadd.f32 1e-05, %v1732_v42 }
 0x830   :  { %v1691_v35 = vpop.xlane.xlu0 %1690  ;;  %v1694_v4 = vpop.xlane.xlu1 %1693 }
 0x831   :  { %2728 = vrsqrt.f32 %v1747_v33  ;;  %v1733_v37 = vmul.f32 0.03125, %v1691_v35  ;;  %v1734_v38 = vmul.f32 0.03125, %v1694_v4 }
 0x832   :  { %2730 = vrsqrt.f32 %v1748_v39 }
 0x833   :  { %v1749_v40 = vadd.f32 1e-05, %v1733_v37  ;;  %v1750_v59 = vadd.f32 1e-05, %v1734_v38 }
 0x834   :  { %v1697_v16 = vpop.xlane.xlu0 %1696  ;;  %v1700_v32 = vpop.xlane.xlu1 %1699 }
 0x835   :  { %2732 = vrsqrt.f32 %v1749_v40  ;;  %v1735_v50 = vmul.f32 0.03125, %v1697_v16  ;;  %v1736_v13 = vmul.f32 0.03125, %v1700_v32 }
 0x836   :  { %2734 = vrsqrt.f32 %v1750_v59 }
 0x837   :  { %v1751_v26 = vadd.f32 1e-05, %v1735_v50  ;;  %v1752_v28 = vadd.f32 1e-05, %v1736_v13 }
 0x838   :  { %v1703_v56 = vpop.xlane.xlu0 %1702  ;;  %v1706_v55 = vpop.xlane.xlu1 %1705 }
 0x839   :  { %2736 = vrsqrt.f32 %v1751_v26  ;;  %v1737_v8 = vmul.f32 0.03125, %v1703_v56  ;;  %v1738_v34 = vmul.f32 0.03125, %v1706_v55 }
 0x83a   :  { %2738 = vrsqrt.f32 %v1752_v28 }
 0x83b   :  { %v2729_v60 = vpop.eup %2728  ;;  %v1753_v52 = vadd.f32 1e-05, %v1737_v8  ;;  %v1754_v62 = vadd.f32 1e-05, %v1738_v34 }
 0x83c   :  { %v2731_v49 = vpop.eup %2730  ;;  %v1779_v10 = vmul.f32 %v2729_v60, %v3940_v54 }
 0x83d   :  { %v1780_v61 = vmul.f32 %v2731_v49, %v3943_v11  ;;  %2740 = vrsqrt.f32 %v1753_v52 }
 0x83e   :  { %2742 = vrsqrt.f32 %v1754_v62  ;;  %v1799_v22 = vmul.f32 %v4038_v31, %v1779_v10 }
 0x83f   :  { %v2733_v42 = vpop.eup %2732  ;;  %v1800_v33 = vmul.f32 %v4038_v31, %v1780_v61 }
 0x840   :  { %v2735_v39 = vpop.eup %2734  ;;  %v1781_v35 = vmul.f32 %v2733_v42, %v3950_v58  ;;  %v1819_v4 = vadd.f32 %v4042_v45, %v1799_v22 }
 0x841   :  { %v1782_v37 = vmul.f32 %v2735_v39, %v3953_v43  ;;  %v1820_v54 = vadd.f32 %v4042_v45, %v1800_v33 }
 0x842   :  { %v1801_v38 = vmul.f32 %v4038_v31, %v1781_v35 }
 0x843   :  { %v2737_v40 = vpop.eup %2736  ;;  %v1802_v11 = vmul.f32 %v4038_v31, %v1782_v37  ;;  %v1835_v59 = vpack.c.bf16 %v1820_v54, %v1819_v4 }
 0x844   :  { %v2739_v16 = vpop.eup %2738  ;;  %v1821_v32 = vadd.f32 %v4042_v45, %v1801_v38  ;;  %v1783_v50 = vmul.f32 %v2737_v40, %v3962_v25 }
 0x845   :  { %v1822_v13 = vadd.f32 %v4042_v45, %v1802_v11  ;;  %v1784_v58 = vmul.f32 %v2739_v16, %v3965_v47  ;;  %2550 = vmatprep.mubr.msk.bf16.mxu1 %vm170_vm0, %v1835_v59 }
 0x846   :  { %v1803_v43 = vmul.f32 %v4038_v31, %v1783_v50  ;;  %v1709_v55 = vpop.xlane.xlu0 %1708  ;;  %v1712_v8 = vpop.xlane.xlu1 %1711 }
 0x847   :  { %v2741_v19 = vpop.eup %2740  ;;  %v1836_v26 = vpack.c.bf16 %v1822_v13, %v1821_v32  ;;  %v1804_v28 = vmul.f32 %v4038_v31, %v1784_v58  ;;  %v1739_v60 = vmul.f32 0.03125, %v1709_v55  ;;  %v1740_v52 = vmul.f32 0.03125, %v1712_v8 }
 0x848   :  { %v2743_v29 = vpop.eup %2742  ;;  %v1785_v56 = vmul.f32 %v2741_v19, %v3974_v15  ;;  %v1823_v34 = vadd.f32 %v4042_v45, %v1803_v43 }
 0x849   :  { %v1786_v25 = vmul.f32 %v2743_v29, %v3977_v46  ;;  %2551 = vmatmul.mubr.msk.bf16.vlgmr.msra.gmra.mrb[32].mxu1 %vm170_vm0, %v1836_v26  ;;  %v1824_v47 = vadd.f32 %v4042_v45, %v1804_v28  ;;  %v1755_v49 = vadd.f32 1e-05, %v1739_v60  ;;  %v1756_v10 = vadd.f32 1e-05, %v1740_v52 }
 0x84a   :  { %v1805_v62 = vmul.f32 %v4038_v31, %v1785_v56  ;;  %v1715_v15 = vpop.xlane.xlu0 %1714  ;;  %v1718_v42 = vpop.xlane.xlu1 %1717 }
 0x84b   :  { %v1837_v61 = vpack.c.bf16 %v1824_v47, %v1823_v34  ;;  %v1806_v22 = vmul.f32 %v4038_v31, %v1786_v25  ;;  %2744 = vrsqrt.f32 %v1755_v49  ;;  %v1741_v39 = vmul.f32 0.03125, %v1715_v15 }
 0x84c   :  { %v1825_v33 = vadd.f32 %v4042_v45, %v1805_v62  ;;  %v1742_v46 = vmul.f32 0.03125, %v1718_v42  ;;  %2746 = vrsqrt.f32 %v1756_v10 }
 0x84d   :  { %2554 = vmatprep.mubr.msk.bf16.mxu1 %vm170_vm0, %v1837_v61  ;;  %v1826_v35 = vadd.f32 %v4042_v45, %v1806_v22  ;;  %v1757_v4 = vadd.f32 1e-05, %v1741_v39 }
 0x84e   :  { %v1758_v37 = vadd.f32 1e-05, %v1742_v46  ;;  %v1721_v38 = vpop.xlane.xlu0 %1720  ;;  %v1724_v40 = vpop.xlane.xlu1 %1723 }
 0x84f   :  { %v1838_v54 = vpack.c.bf16 %v1826_v35, %v1825_v33  ;;  %2748 = vrsqrt.f32 %v1757_v4  ;;  %v1743_v11 = vmul.f32 0.03125, %v1721_v38  ;;  %v1744_v59 = vmul.f32 0.03125, %v1724_v40 }
 0x850   :  { %2750 = vrsqrt.f32 %v1758_v37 }
 0x851   :  { %2555 = vmatmul.mubr.msk.bf16.gmra.mrb[36].mxu1 %vm170_vm0, %v1838_v54  ;;  %v1759_v16 = vadd.f32 1e-05, %v1743_v11  ;;  %v1760_v32 = vadd.f32 1e-05, %v1744_v59 }
 0x852   :  { %v1727_v50 = vpop.xlane.xlu0 %1726  ;;  %v1730_v13 = vpop.xlane.xlu1 %1729 }
 0x853   :  { %2752 = vrsqrt.f32 %v1759_v16  ;;  %v1745_v58 = vmul.f32 0.03125, %v1727_v50  ;;  %v1746_v43 = vmul.f32 0.03125, %v1730_v13  ;;  %v2622_v50 = vld [vmem:[#allocation11 + $0x30] sm:$0xff]   ;;  %v2623_v13 = vld [vmem:[#allocation11 + $0x38] sm:$0xff]  }
 0x854   :  { %2754 = vrsqrt.f32 %v1760_v32  ;;  %v2620_v32 = vld [vmem:[#allocation11 + $0x20] sm:$0xff]  }
 0x855   :  { %v2745_v19 = vpop.eup %2744  ;;  %v1761_v26 = vadd.f32 1e-05, %v1745_v58  ;;  %v1762_v28 = vadd.f32 1e-05, %v1746_v43  ;;  %2566 = vmatprep.subr.bf16.mxu0 %v2620_v32 }
 0x856   :  { %v2747_v29 = vpop.eup %2746  ;;  %v1787_v56 = vmul.f32 %v2745_v19, %v3988_v2  ;;  %2567 = vmatpush3.bf16.msra.mxu0 %v2620_v32 }
 0x857   :  { %v1788_v55 = vmul.f32 %v2747_v29, %v3991_v9  ;;  %2756 = vrsqrt.f32 %v1761_v26 }
 0x858   :  { %2758 = vrsqrt.f32 %v1762_v28  ;;  %v1807_v8 = vmul.f32 %v4038_v31, %v1787_v56 }
 0x859   :  { %v2749_v34 = vpop.eup %2748  ;;  %v1808_v25 = vmul.f32 %v4038_v31, %v1788_v55 }
 0x85a   :  { %v2751_v60 = vpop.eup %2750  ;;  %v1789_v52 = vmul.f32 %v2749_v34, %v3998_v57  ;;  %v1827_v47 = vadd.f32 %v4042_v45, %v1807_v8 }
 0x85b   :  { %v1790_v62 = vmul.f32 %v2751_v60, %v4001_v20  ;;  %v1828_v49 = vadd.f32 %v4042_v45, %v1808_v25 }
 0x85c   :  { %v1809_v2 = vmul.f32 %v4038_v31, %v1789_v52 }
 0x85d   :  { %v2753_v10 = vpop.eup %2752  ;;  %v1839_v9 = vpack.c.bf16 %v1828_v49, %v1827_v47  ;;  %v1810_v61 = vmul.f32 %v4038_v31, %v1790_v62 }
 0x85e   :  { %v2755_v22 = vpop.eup %2754  ;;  %v1791_v15 = vmul.f32 %v2753_v10, %v4010_v1  ;;  %v1829_v42 = vadd.f32 %v4042_v45, %v1809_v2 }
 0x85f   :  { %v1792_v33 = vmul.f32 %v2755_v22, %v4013_v23  ;;  %2558 = vmatprep.mubr.msk.bf16.mxu1 %vm170_vm0, %v1839_v9  ;;  %v1830_v57 = vadd.f32 %v4042_v45, %v1810_v61 }
 0x860   :  { %v1811_v20 = vmul.f32 %v4038_v31, %v1791_v15 }
 0x861   :  { %v2757_v39 = vpop.eup %2756  ;;  %v1840_v46 = vpack.c.bf16 %v1830_v57, %v1829_v42  ;;  %v1812_v35 = vmul.f32 %v4038_v31, %v1792_v33 }
 0x862   :  { %v2759_v4 = vpop.eup %2758  ;;  %v1793_v37 = vmul.f32 %v2757_v39, %v4022_v27  ;;  %v1831_v54 = vadd.f32 %v4042_v45, %v1811_v20 }
 0x863   :  { %v1794_v1 = vmul.f32 %v2759_v4, %v4025_v5  ;;  %2559 = vmatmul.mubr.msk.bf16.gmra.mrb[40].mxu1 %vm170_vm0, %v1840_v46  ;;  %v1832_v23 = vadd.f32 %v4042_v45, %v1812_v35  ;;  %v2621_v5 = vld [vmem:[#allocation11 + $0x28] sm:$0xff]  }
 0x864   :  { %v1813_v38 = vmul.f32 %v4038_v31, %v1793_v37  ;;  %2568 = vmatprep.subr.bf16.mxu0 %v2621_v5 }
 0x865   :  { %v1841_v40 = vpack.c.bf16 %v1832_v23, %v1831_v54  ;;  %v1814_v11 = vmul.f32 %v4038_v31, %v1794_v1  ;;  %2569 = vmatpush3.bf16.msra.mxu0 %v2621_v5  ;;  %v1845_v31 = vsub.s32 7, %v3300_v6 }
 0x866   :  { %v1833_v59 = vadd.f32 %v4042_v45, %v1813_v38  ;;  %2570 = vmatprep.subr.bf16.mxu0 %v2622_v50 }
 0x867   :  { %2562 = vmatprep.mubr.msk.bf16.mxu1 %vm170_vm0, %v1841_v40  ;;  %v1834_v16 = vadd.f32 %v4042_v45, %v1814_v11  ;;  %v4101_v58 = vrot.slane %v3726_v12, %v1845_v31 }
 0x869   :  { %v1842_v27 = vpack.c.bf16 %v1834_v16, %v1833_v59  ;;  %2571 = vmatpush3.bf16.msra.mxu0 %v2622_v50 }
 0x86a   :  { %2572 = vmatprep.subr.bf16.mxu0 %v2623_v13 }
 0x86b   :  { %2563 = vmatmul.mubr.msk.bf16.gmra.mrb[44].mxu1 %vm170_vm0, %v1842_v27 }
 0x86d   :  { %2573 = vmatpush3.bf16.msra.mxu0 %v2623_v13 }
 0x91c   :  { %v2552_v45 = vpop.f32.mrb[32].mxu1 }
 0x91d   :  { %v4104_v43 = vadd.f32 %v2552_v45, %v4101_v58  ;;  %v1917_v19 = vpop.f32.mrb[33].mxu1 }
 0x91e   :  { %v4107_v26 = vadd.f32 %v1917_v19, %v4101_v58  ;;  %v2553_v28 = vpop.f32.mrb[34].mxu1 }
 0x91f   :  { %v1982_v29 = vmul.f32 %v4104_v43, %v4104_v43  ;;  %v4112_v56 = vadd.f32 %v2553_v28, %v4101_v58  ;;  %v1920_v55 = vpop.f32.mrb[35].mxu1 }
 0x920   :  { %v1980_v12 = vmul.f32 %v4107_v26, %v4107_v26  ;;  %v4117_v8 = vadd.f32 %v1920_v55, %v4101_v58 }
 0x921   :  { %v1998_v34 = vmul.f32 %v1982_v29, %v4104_v43  ;;  %v1983_v25 = vmul.f32 %v4112_v56, %v4112_v56 }
 0x922   :  { %v1996_v60 = vmul.f32 %v1980_v12, %v4107_v26  ;;  %v1981_v52 = vmul.f32 %v4117_v8, %v4117_v8 }
 0x923   :  { %v2014_v47 = vmul.f32 0.044715, %v1998_v34  ;;  %v1999_v62 = vmul.f32 %v1983_v25, %v4112_v56 }
 0x924   :  { %v2012_v49 = vmul.f32 0.044715, %v1996_v60  ;;  %v1997_v2 = vmul.f32 %v1981_v52, %v4117_v8  ;;  %v2556_v10 = vpop.f32.mrb[36].mxu1 }
 0x925   :  { %v2030_v9 = vadd.f32 %v2014_v47, %v4104_v43  ;;  %v2015_v61 = vmul.f32 0.044715, %v1999_v62  ;;  %v4129_v22 = vadd.f32 %v2556_v10, %v4101_v58  ;;  %v1933_v15 = vpop.f32.mrb[37].mxu1 }
 0x926   :  { %v2028_v42 = vadd.f32 %v2012_v49, %v4107_v26  ;;  %v2013_v33 = vmul.f32 0.044715, %v1997_v2  ;;  %v4133_v57 = vadd.f32 %v1933_v15, %v4101_v58  ;;  %v2557_v20 = vpop.f32.mrb[38].mxu1 }
 0x927   :  { %v2046_v39 = vmul.f32 0.7978846, %v2030_v9  ;;  %v2031_v46 = vadd.f32 %v2015_v61, %v4112_v56  ;;  %v1986_v35 = vmul.f32 %v4129_v22, %v4129_v22  ;;  %v4139_v4 = vadd.f32 %v2557_v20, %v4101_v58  ;;  %v1936_v37 = vpop.f32.mrb[39].mxu1 }
 0x928   :  { %v2044_v54 = vmul.f32 0.7978846, %v2028_v42  ;;  %v2029_v1 = vadd.f32 %v2013_v33, %v4117_v8  ;;  %v1984_v23 = vmul.f32 %v4133_v57, %v4133_v57  ;;  %v4145_v38 = vadd.f32 %v1936_v37, %v4101_v58 }
 0x929   :  { %2760 = vtanh.f32 %v2046_v39  ;;  %v2047_v40 = vmul.f32 0.7978846, %v2031_v46  ;;  %v2002_v11 = vmul.f32 %v1986_v35, %v4129_v22  ;;  %v1987_v59 = vmul.f32 %v4139_v4, %v4139_v4 }
 0x92a   :  { %2762 = vtanh.f32 %v2044_v54  ;;  %v2045_v16 = vmul.f32 0.7978846, %v2029_v1  ;;  %v2000_v27 = vmul.f32 %v1984_v23, %v4133_v57  ;;  %v1985_v32 = vmul.f32 %v4145_v38, %v4145_v38 }
 0x92b   :  { %2764 = vtanh.f32 %v2047_v40  ;;  %v2018_v5 = vmul.f32 0.044715, %v2002_v11  ;;  %v2003_v50 = vmul.f32 %v1987_v59, %v4139_v4 }
 0x92c   :  { %2766 = vtanh.f32 %v2045_v16  ;;  %v2016_v13 = vmul.f32 0.044715, %v2000_v27  ;;  %v2001_v31 = vmul.f32 %v1985_v32, %v4145_v38 }
 0x92d   :  { %v2034_v45 = vadd.f32 %v2018_v5, %v4129_v22  ;;  %v2019_v19 = vmul.f32 0.044715, %v2003_v50 }
 0x92e   :  { %v2032_v28 = vadd.f32 %v2016_v13, %v4133_v57  ;;  %v2017_v29 = vmul.f32 0.044715, %v2001_v31 }
 0x92f   :  { %v2050_v55 = vmul.f32 0.7978846, %v2034_v45  ;;  %v2035_v12 = vadd.f32 %v2019_v19, %v4139_v4 }
 0x930   :  { %v2048_v34 = vmul.f32 0.7978846, %v2032_v28  ;;  %v2033_v25 = vadd.f32 %v2017_v29, %v4145_v38 }
 0x931   :  { %2768 = vtanh.f32 %v2050_v55  ;;  %v2051_v60 = vmul.f32 0.7978846, %v2035_v12 }
 0x932   :  { %2770 = vtanh.f32 %v2048_v34  ;;  %v2049_v52 = vmul.f32 0.7978846, %v2033_v25 }
 0x933   :  { %v2761_v47 = vpop.eup %2760  ;;  %2772 = vtanh.f32 %v2051_v60 }
 0x934   :  { %v2763_v62 = vpop.eup %2762  ;;  %v2078_v49 = vadd.f32 1.0, %v2761_v47  ;;  %2774 = vtanh.f32 %v2049_v52 }
 0x935   :  { %v2765_v2 = vpop.eup %2764  ;;  %v2076_v10 = vadd.f32 1.0, %v2763_v62 }
 0x936   :  { %v2767_v9 = vpop.eup %2766  ;;  %v2094_v61 = vmul.f32 0.5, %v2078_v49  ;;  %v2079_v15 = vadd.f32 1.0, %v2765_v2  ;;  %v2560_v39 = vpop.f32.mrb[40].mxu1 }
 0x937   :  { %v2092_v42 = vmul.f32 0.5, %v2076_v10  ;;  %v2077_v33 = vadd.f32 1.0, %v2767_v9  ;;  %v4160_v35 = vadd.f32 %v2560_v39, %v4101_v58  ;;  %v1949_v37 = vpop.f32.mrb[41].mxu1 }
 0x938   :  { %v2095_v20 = vmul.f32 0.5, %v2079_v15  ;;  %v2110_v54 = vmul.f32 %v2094_v61, %v4104_v43  ;;  %v4165_v23 = vadd.f32 %v1949_v37, %v4101_v58  ;;  %v2561_v40 = vpop.f32.mrb[42].mxu1 }
 0x939   :  { %v2093_v46 = vmul.f32 0.5, %v2077_v33  ;;  %v2108_v59 = vmul.f32 %v2092_v42, %v4107_v26  ;;  %v1990_v27 = vmul.f32 %v4160_v35, %v4160_v35  ;;  %v4172_v32 = vadd.f32 %v2561_v40, %v4101_v58  ;;  %v1952_v5 = vpop.f32.mrb[43].mxu1 }
 0x93a   :  { %v2111_v1 = vmul.f32 %v2095_v20, %v4112_v56  ;;  %v1988_v13 = vmul.f32 %v4165_v23, %v4165_v23  ;;  %v4177_v31 = vadd.f32 %v1952_v5, %v4101_v58 }
 0x93b   :  { %v2769_v11 = vpop.eup %2768  ;;  %v2109_v16 = vmul.f32 %v2093_v46, %v4117_v8  ;;  %v2006_v8 = vmul.f32 %v1990_v27, %v4160_v35  ;;  %v1991_v19 = vmul.f32 %v4172_v32, %v4172_v32 }
 0x93c   :  { %v2771_v43 = vpop.eup %2770  ;;  %v2125_v50 = vpack.c.bf16 %v2111_v1, %v2110_v54  ;;  %v2082_v56 = vadd.f32 1.0, %v2769_v11  ;;  %v2004_v34 = vmul.f32 %v1988_v13, %v4165_v23  ;;  %v1989_v25 = vmul.f32 %v4177_v31, %v4177_v31 }
 0x93d   :  { %v2773_v45 = vpop.eup %2772  ;;  %v2080_v26 = vadd.f32 1.0, %v2771_v43  ;;  %v2124_v28 = vpack.c.bf16 %v2109_v16, %v2108_v59  ;;  %v2022_v47 = vmul.f32 0.044715, %v2006_v8  ;;  %v2007_v62 = vmul.f32 %v1991_v19, %v4172_v32 }
 0x93e   :  { %v2775_v29 = vpop.eup %2774  ;;  %v2098_v55 = vmul.f32 0.5, %v2082_v56  ;;  %v2083_v12 = vadd.f32 1.0, %v2773_v45  ;;  %v2020_v10 = vmul.f32 0.044715, %v2004_v34  ;;  %v2005_v9 = vmul.f32 %v1989_v25, %v4177_v31  ;;  %v2564_v61 = vpop.f32.mrb[44].mxu1 }
 0x93f   :  { %v2096_v60 = vmul.f32 0.5, %v2080_v26  ;;  %v2081_v52 = vadd.f32 1.0, %v2775_v29  ;;  %2574 = vmatprep.mubr.msk.bf16.mxu0 %vm2160_vm3, %v2124_v28  ;;  %v2038_v33 = vadd.f32 %v2022_v47, %v4160_v35  ;;  %v2023_v20 = vmul.f32 0.044715, %v2007_v62  ;;  %v1965_v39 = vpop.f32.mrb[45].mxu1 }
 0x940   :  { %v2114_v49 = vmul.f32 %v2098_v55, %v4129_v22  ;;  %v2099_v2 = vmul.f32 0.5, %v2083_v12  ;;  %2575 = vmatmul.mubr.msk.bf16.vlgmr.msra.gmra.mrb[32].mxu0 %vm2160_vm3, %v2125_v50  ;;  %v2036_v37 = vadd.f32 %v2020_v10, %v4165_v23  ;;  %v2021_v54 = vmul.f32 0.044715, %v2005_v9  ;;  %v2565_v1 = vpop.f32.mrb[46].mxu1 }
 0x941   :  { %v2112_v15 = vmul.f32 %v2096_v60, %v4133_v57  ;;  %v2097_v42 = vmul.f32 0.5, %v2081_v52  ;;  %v4195_v22 = vadd.f32 %v2564_v61, %v4101_v58  ;;  %v2054_v11 = vmul.f32 0.7978846, %v2038_v33  ;;  %v1968_v16 = vpop.f32.mrb[47].mxu1 }
 0x942   :  { %v2115_v46 = vmul.f32 %v2099_v2, %v4139_v4  ;;  %v2039_v59 = vadd.f32 %v2023_v20, %v4172_v32  ;;  %v4200_v57 = vadd.f32 %v1965_v39, %v4101_v58  ;;  %v2052_v27 = vmul.f32 0.7978846, %v2036_v37 }
 0x943   :  { %v2113_v40 = vmul.f32 %v2097_v42, %v4145_v38  ;;  %v2037_v5 = vadd.f32 %v2021_v54, %v4177_v31  ;;  %v1994_v4 = vmul.f32 %v4195_v22, %v4195_v22  ;;  %v4206_v43 = vadd.f32 %v2565_v1, %v4101_v58 }
 0x944   :  { %2776 = vtanh.f32 %v2054_v11  ;;  %v2055_v50 = vmul.f32 0.7978846, %v2039_v59  ;;  %v1992_v38 = vmul.f32 %v4200_v57, %v4200_v57  ;;  %v4211_v56 = vadd.f32 %v1968_v16, %v4101_v58 }
 0x945   :  { %2778 = vtanh.f32 %v2052_v27  ;;  %v2053_v13 = vmul.f32 0.7978846, %v2037_v5  ;;  %v2010_v45 = vmul.f32 %v1994_v4, %v4195_v22  ;;  %v1995_v26 = vmul.f32 %v4206_v43, %v4206_v43 }
 0x946   :  { %2780 = vtanh.f32 %v2055_v50  ;;  %v2008_v8 = vmul.f32 %v1992_v38, %v4200_v57  ;;  %v1993_v19 = vmul.f32 %v4211_v56, %v4211_v56  ;;  %v2126_v28 = vpack.c.bf16 %v2113_v40, %v2112_v15 }
 0x947   :  { %2782 = vtanh.f32 %v2053_v13  ;;  %v2026_v29 = vmul.f32 0.044715, %v2010_v45  ;;  %v2011_v55 = vmul.f32 %v1995_v26, %v4206_v43  ;;  %v2127_v58 = vpack.c.bf16 %v2115_v46, %v2114_v49 }
 0x948   :  { %v2024_v12 = vmul.f32 0.044715, %v2008_v8  ;;  %v2009_v34 = vmul.f32 %v1993_v19, %v4211_v56  ;;  %2578 = vmatprep.mubr.msk.bf16.mxu0 %vm2160_vm3, %v2126_v28 }
 0x949   :  { %v2042_v25 = vadd.f32 %v2026_v29, %v4195_v22  ;;  %v2027_v60 = vmul.f32 0.044715, %v2011_v55  ;;  %2579 = vmatmul.mubr.msk.bf16.gmra.mrb[36].mxu0 %vm2160_vm3, %v2127_v58 }
 0x94a   :  { %v2040_v52 = vadd.f32 %v2024_v12, %v4200_v57  ;;  %v2025_v47 = vmul.f32 0.044715, %v2009_v34 }
 0x94b   :  { %v2058_v62 = vmul.f32 0.7978846, %v2042_v25  ;;  %v2043_v2 = vadd.f32 %v2027_v60, %v4206_v43 }
 0x94c   :  { %v2056_v10 = vmul.f32 0.7978846, %v2040_v52  ;;  %v2041_v9 = vadd.f32 %v2025_v47, %v4211_v56  ;;  %v2134_v47 = vsub.s32 6, %v3300_v6 }
 0x94d   :  { %2784 = vtanh.f32 %v2058_v62  ;;  %v2059_v49 = vmul.f32 0.7978846, %v2043_v2  ;;  %v2809_v62 = vld [vmem:[#allocation10] sm:$0xff] }
 0x94e   :  { %v2777_v61 = vpop.eup %2776  ;;  %2786 = vtanh.f32 %v2056_v10  ;;  %v2057_v15 = vmul.f32 0.7978846, %v2041_v9  ;;  %v2135_v2 = vrot.slane %v2809_v62, %v2134_v47 }
 0x94f   :  { %v2779_v42 = vpop.eup %2778  ;;  %v2086_v33 = vadd.f32 1.0, %v2777_v61  ;;  %2788 = vtanh.f32 %v2059_v49 }
 0x950   :  { %v2781_v20 = vpop.eup %2780  ;;  %v2084_v39 = vadd.f32 1.0, %v2779_v42  ;;  %2790 = vtanh.f32 %v2057_v15 }
 0x951   :  { %v2783_v46 = vpop.eup %2782  ;;  %v2102_v37 = vmul.f32 0.5, %v2086_v33  ;;  %v2087_v54 = vadd.f32 1.0, %v2781_v20 }
 0x952   :  { %v2100_v1 = vmul.f32 0.5, %v2084_v39  ;;  %v2085_v40 = vadd.f32 1.0, %v2783_v46 }
 0x953   :  { %v2103_v11 = vmul.f32 0.5, %v2087_v54  ;;  %v2118_v16 = vmul.f32 %v2102_v37, %v4160_v35 }
 0x954   :  { %v2101_v59 = vmul.f32 0.5, %v2085_v40  ;;  %v2116_v5 = vmul.f32 %v2100_v1, %v4165_v23 }
 0x955   :  { %v2119_v27 = vmul.f32 %v2103_v11, %v4172_v32 }
 0x956   :  { %v2117_v4 = vmul.f32 %v2101_v59, %v4177_v31 }
 0x957   :  { %v2785_v50 = vpop.eup %2784  ;;  %v2129_v38 = vpack.c.bf16 %v2119_v27, %v2118_v16 }
 0x958   :  { %v2787_v13 = vpop.eup %2786  ;;  %v2090_v45 = vadd.f32 1.0, %v2785_v50  ;;  %v2128_v26 = vpack.c.bf16 %v2117_v4, %v2116_v5 }
 0x959   :  { %v2789_v8 = vpop.eup %2788  ;;  %v2088_v19 = vadd.f32 1.0, %v2787_v13 }
 0x95a   :  { %v2791_v28 = vpop.eup %2790  ;;  %v2106_v29 = vmul.f32 0.5, %v2090_v45  ;;  %v2091_v55 = vadd.f32 1.0, %v2789_v8  ;;  %2582 = vmatprep.mubr.msk.bf16.mxu0 %vm2160_vm3, %v2128_v26 }
 0x95b   :  { %v2104_v58 = vmul.f32 0.5, %v2088_v19  ;;  %v2089_v35 = vadd.f32 1.0, %v2791_v28  ;;  %2583 = vmatmul.mubr.msk.bf16.gmra.mrb[40].mxu0 %vm2160_vm3, %v2129_v38 }
 0x95c   :  { %v2107_v32 = vmul.f32 0.5, %v2091_v55  ;;  %v2122_v31 = vmul.f32 %v2106_v29, %v4195_v22 }
 0x95d   :  { %v2105_v23 = vmul.f32 0.5, %v2089_v35  ;;  %v2120_v34 = vmul.f32 %v2104_v58, %v4200_v57 }
 0x95e   :  { %v2123_v12 = vmul.f32 %v2107_v32, %v4206_v43 }
 0x95f   :  { %v2121_v25 = vmul.f32 %v2105_v23, %v4211_v56 }
 0x960   :  { %v2131_v60 = vpack.c.bf16 %v2123_v12, %v2122_v31 }
 0x961   :  { %v2130_v52 = vpack.c.bf16 %v2121_v25, %v2120_v34 }
 0x963   :  { %2586 = vmatprep.mubr.msk.bf16.mxu0 %vm2160_vm3, %v2130_v52 }
 0x964   :  { %2587 = vmatmul.mubr.msk.bf16.gmra.mrb[44].mxu0 %vm2160_vm3, %v2131_v60 }
 0xa13   :  { %v2576_v10 = vpop.f32.mrb[32].mxu0 }
 0xa14   :  { %v2228_v9 = vadd.f32 %v2576_v10, %v2135_v2  ;;  %v2219_v49 = vpop.f32.mrb[33].mxu0 }
 0xa15   :  { %v2220_v22 = vadd.f32 %v2219_v49, %v2135_v2  ;;  %v2577_v61 = vpop.f32.mrb[34].mxu0 }
 0xa16   :  { %v2284_v43 = vadd.f32 %v2228_v9, %v3876_v63  ;;  %v2231_v57 = vadd.f32 %v2577_v61, %v2135_v2  ;;  %v2222_v15 = vpop.f32.mrb[35].mxu0 }
 0xa17   :  { %v2282_v56 = vadd.f32 %v2220_v22, %v3868_v44  ;;  %v2223_v42 = vadd.f32 %v2222_v15, %v2135_v2 }
 0xa18   :  { %2300 = vst.msk [vmem:[#allocation14 + $0x10] sm:$0xff] %vm170_vm0, %v2284_v43  ;;  %v2285_v33 = vadd.f32 %v2231_v57, %v3874_v7 }
 0xa19   :  { %2298 = vst.msk [vmem:[#allocation14] sm:$0xff] %vm170_vm0, %v2282_v56  ;;  %v2283_v6 = vadd.f32 %v2223_v42, %v3866_v17 }
 0xa1a   :  { %2301 = vst.msk [vmem:[#allocation14 + $0x18] sm:$0xff] %vm170_vm0, %v2285_v33 }
 0xa1b   :  { %2299 = vst.msk [vmem:[#allocation14 + $0x8] sm:$0xff] %vm170_vm0, %v2283_v6 }
 0xa1c   :  { %v2580_v20 = vpop.f32.mrb[36].mxu0 }
 0xa1d   :  { %v2244_v39 = vadd.f32 %v2580_v20, %v2135_v2  ;;  %v2235_v63 = vpop.f32.mrb[37].mxu0 }
 0xa1e   :  { %v2236_v46 = vadd.f32 %v2235_v63, %v2135_v2  ;;  %v2581_v37 = vpop.f32.mrb[38].mxu0 }
 0xa1f   :  { %v2288_v44 = vadd.f32 %v2244_v39, %v3893_v18  ;;  %v2247_v54 = vadd.f32 %v2581_v37, %v2135_v2  ;;  %v2238_v1 = vpop.f32.mrb[39].mxu0 }
 0xa20   :  { %v2286_v40 = vadd.f32 %v2236_v46, %v3885_v24  ;;  %v2239_v7 = vadd.f32 %v2238_v1, %v2135_v2 }
 0xa21   :  { %2304 = vst.msk [vmem:[#allocation14 + $0x30] sm:$0xff] %vm170_vm0, %v2288_v44  ;;  %v2289_v17 = vadd.f32 %v2247_v54, %v3891_v21 }
 0xa22   :  { %2302 = vst.msk [vmem:[#allocation14 + $0x20] sm:$0xff] %vm170_vm0, %v2286_v40  ;;  %v2287_v11 = vadd.f32 %v2239_v7, %v3883_v0 }
 0xa23   :  { %2305 = vst.msk [vmem:[#allocation14 + $0x38] sm:$0xff] %vm170_vm0, %v2289_v17 }
 0xa24   :  { %2303 = vst.msk [vmem:[#allocation14 + $0x28] sm:$0xff] %vm170_vm0, %v2287_v11 }
 0xa2e   :  { %v2584_v59 = vpop.f32.mrb[40].mxu0 }
 0xa2f   :  { %v2260_v16 = vadd.f32 %v2584_v59, %v2135_v2  ;;  %v2251_v18 = vpop.f32.mrb[41].mxu0 }
 0xa30   :  { %v2252_v27 = vadd.f32 %v2251_v18, %v2135_v2  ;;  %v2585_v5 = vpop.f32.mrb[42].mxu0 }
 0xa31   :  { %v2292_v24 = vadd.f32 %v2260_v16, %v3917_v48  ;;  %v2263_v4 = vadd.f32 %v2585_v5, %v2135_v2  ;;  %v2254_v50 = vpop.f32.mrb[43].mxu0 }
 0xa32   :  { %v2290_v38 = vadd.f32 %v2252_v27, %v3909_v36  ;;  %v2255_v21 = vadd.f32 %v2254_v50, %v2135_v2 }
 0xa33   :  { %2308 = vst.msk [vmem:[#allocation14 + $0x50] sm:$0xff] %vm170_vm0, %v2292_v24  ;;  %v2293_v0 = vadd.f32 %v2263_v4, %v3915_v14 }
 0xa34   :  { %2306 = vst.msk [vmem:[#allocation14 + $0x40] sm:$0xff] %vm170_vm0, %v2290_v38  ;;  %v2291_v13 = vadd.f32 %v2255_v21, %v3907_v30 }
 0xa35   :  { %2309 = vst.msk [vmem:[#allocation14 + $0x58] sm:$0xff] %vm170_vm0, %v2293_v0 }
 0xa36   :  { %2307 = vst.msk [vmem:[#allocation14 + $0x48] sm:$0xff] %vm170_vm0, %v2291_v13 }
 0xa37   :  { %v2588_v45 = vpop.f32.mrb[44].mxu0 }
 0xa38   :  { %v2276_v26 = vadd.f32 %v2588_v45, %v2135_v2  ;;  %v2267_v48 = vpop.f32.mrb[45].mxu0 }
 0xa39   :  { %v2268_v8 = vadd.f32 %v2267_v48, %v2135_v2  ;;  %v2589_v19 = vpop.f32.mrb[46].mxu0 }
 0xa3a   :  { %v2296_v36 = vadd.f32 %v2276_v26, %v3933_v53  ;;  %v2279_v28 = vadd.f32 %v2589_v19, %v2135_v2  ;;  %v2270_v29 = vpop.f32.mrb[47].mxu0 }
 0xa3b   :  { %v2294_v14 = vadd.f32 %v2268_v8, %v3925_v51  ;;  %v2271_v55 = vadd.f32 %v2270_v29, %v2135_v2 }
 0xa3c   :  { %2312 = vst.msk [vmem:[#allocation14 + $0x70] sm:$0xff] %vm170_vm0, %v2296_v36  ;;  %v2297_v30 = vadd.f32 %v2279_v28, %v3931_v3 }
 0xa3d   :  { %2310 = vst.msk [vmem:[#allocation14 + $0x60] sm:$0xff] %vm170_vm0, %v2294_v14  ;;  %v2295_v58 = vadd.f32 %v2271_v55, %v3923_v41 }
 0xa3e   :  { %2313 = vst.msk [vmem:[#allocation14 + $0x78] sm:$0xff] %vm170_vm0, %v2297_v30 }
 0xa3f   :  { %2311 = vst.msk [vmem:[#allocation14 + $0x68] sm:$0xff] %vm170_vm0, %v2295_v58 }
 0xa40   :  { %2975 = shalt.err (!%p2972_p4)
}
 0xa41   :  { %s2976_s20 = scalar_lea.hbm %s4294_s7, 2048 }
 0xa42   :  { %p2977_p5 = scmp.ne.s32.totalorder %s4294_s7, %s2976_s20  ;;  %p2980_p6 = scmp.lt.u32.totalorder %s2976_s20, %s4294_s7 }
 0xa44   :  { %p2982_p7 = pnand %p2980_p6, %p2977_p5 }
 0xa46   :  { %2985 = shalt.err (!%p2982_p7)
}
 0xa47   :  { %2325 = dma.vmem_to_hbm [thread:$0]  %s2320_s11, 2048, %s4294_s7, [#allocation4], %s3004_s5, %s3004_s5, %s3005_s27  }
 0xa48   :  { %2994 = dma.done.wait [#allocation4], 2048  }
 0xa49   :  { %2995 = vsyncadd [#allocation4], 4294965248 }
 0xa4a   :  { %2329 = vsyncpa [#allocation3], 1 }
 0xa4b   :  { %2330 = vsyncpa [#allocation6], 1 }
 0xa4c   :  { %2331 = vsyncpa [#allocation9], 1 }
 0xa4d   :  { %2332 = vsyncpa [#allocation12], 1 }
 0xa4e   :  { %2333 = vsyncpa [#allocation4], 1 }

</bundles_post_ra>
